<compile_context>
chip_gen: v7x
topology: tpu7x:2x2x1
jax: 0.10.0
libtpu: 0.0.40
codegen_flags: <defaults>
</compile_context>

<pallas_src>
import functools

import jax
import jax.numpy as jnp
from jax.experimental import pallas as pl
from jax.experimental.pallas import tpu as pltpu

IN_F = 784      # input features (kept unpadded: 784 = full array dim, no extra HBM traffic)
HID = 256       # hidden dim padded 200 -> 256 (lane aligned)
OUT_PAD = 128   # output dim padded 10 -> 128 (lane-dense store)
N_OUT = 10


def _round_up(v, m):
    return (v + m - 1) // m * m


def _device_kind():
    try:
        return jax.devices()[0].device_kind.lower()
    except Exception:
        return ""


def mlp_kernel(x_ref, w1_ref, b1_ref, w2_ref, b2_ref, w3_ref, b3_ref, out_ref,
               *, act_dtype):
    # x arrives as f32 from HBM; cast to bf16 on the VPU (free under the DMA).
    x = x_ref[...].astype(jnp.bfloat16)

    # Layer 1: Linear(784, 256) + Tanh  (bf16 MXU, f32 accumulate)
    h1 = jnp.dot(x, w1_ref[...], preferred_element_type=jnp.float32)
    h1 = jnp.tanh(h1.astype(act_dtype) + b1_ref[...])

    # Layer 2: Linear(256, 256) + Tanh
    h2 = jnp.dot(h1.astype(jnp.bfloat16), w2_ref[...],
                 preferred_element_type=jnp.float32)
    h2 = jnp.tanh(h2.astype(act_dtype) + b2_ref[...])

    # Layer 3: Linear(256, 128)  (only first 10 columns are real)
    out = jnp.dot(h2.astype(jnp.bfloat16), w3_ref[...],
                  preferred_element_type=jnp.float32)
    out_ref[...] = (out + b3_ref[...]).astype(out_ref.dtype)


def _prepare_params(w1, b1, w2, b2, w3, b3, act_dtype):
    """Zero-pad to lane-aligned shapes; weights bf16, b1/b2 in act_dtype, b3 f32."""
    def pad(a, shape):
        return jnp.pad(a, [(0, s - d) for d, s in zip(a.shape, shape)])

    w1p = pad(w1, (IN_F, HID)).astype(jnp.bfloat16)
    b1p = pad(b1.reshape(1, -1), (1, HID)).astype(act_dtype)
    w2p = pad(w2, (HID, HID)).astype(jnp.bfloat16)
    b2p = pad(b2.reshape(1, -1), (1, HID)).astype(act_dtype)
    w3p = pad(w3, (HID, OUT_PAD)).astype(jnp.bfloat16)
    b3p = pad(b3.reshape(1, -1), (1, OUT_PAD)).astype(jnp.float32)
    return w1p, b1p, w2p, b2p, w3p, b3p


def _choose_tiling(batch, max_tile, want_two_tiles):
    """Pick (tile_m, padded_batch, n_tiles) with bounded tail waste."""
    b16 = _round_up(batch, 16)                 # 16-row align (bf16 sublane pack)
    n_tiles = max(1, -(-b16 // max_tile))
    if want_two_tiles and n_tiles == 1 and b16 >= 256:
        n_tiles = 2                            # give both v7x TensorCores work
    tile_m = _round_up(-(-batch // n_tiles), 16)
    return tile_m, tile_m * n_tiles, n_tiles


def mlp_forward(x, w1, b1, w2, b2, w3, b3, *, tile_m=1024):
    batch = x.shape[0]

    kind = _device_kind()
    is_v5 = "v5" in kind
    multi_tc = not ("v5" in kind or "v6" in kind)    # v7x+: 2 TensorCores/chip
    act_dtype = jnp.float32 if is_v5 else jnp.bfloat16   # bf16 VPU/EUP on v6e/v7x

    # v5e has the smallest comfortable scoped-VMEM budget; cap its tile.
    max_tile = min(tile_m, 1024) if is_v5 else tile_m
    tm, padded_batch, n_tiles = _choose_tiling(batch, max_tile, multi_tc)

    xp = x.astype(jnp.float32)
    if padded_batch != batch:
        xp = jnp.pad(xp, ((0, padded_batch - batch), (0, 0)))

    params = _prepare_params(w1, b1, w2, b2, w3, b3, act_dtype)

    flops = 2 * padded_batch * (IN_F * HID + HID * HID + HID * OUT_PAD)
    bytes_accessed = (padded_batch * IN_F * 4                       # x (f32 in)
                      + (IN_F * HID + HID * HID + HID * OUT_PAD) * 2  # weights bf16
                      + (2 * HID + OUT_PAD) * 4                     # biases
                      + padded_batch * OUT_PAD * 2)                 # out bf16
    cost = pl.CostEstimate(flops=flops,
                           transcendentals=2 * padded_batch * HID,
                           bytes_accessed=bytes_accessed)

    kernel = functools.partial(mlp_kernel, act_dtype=act_dtype)

    def call(single_buffer_weights):
        def wspec(shape):
            kwargs = {}
            if single_buffer_weights:
                # Constant index map -> weights never change block; one buffer is enough.
                kwargs["pipeline_mode"] = pl.Buffered(1)
            return pl.BlockSpec(shape, lambda i: (0, 0), **kwargs)

        return pl.pallas_call(
            kernel,
            out_shape=jax.ShapeDtypeStruct((padded_batch, OUT_PAD), jnp.bfloat16),
            grid=(n_tiles,),
            in_specs=[
                pl.BlockSpec((tm, IN_F), lambda i: (i, 0)),   # x tile (pipelined, f32)
                wspec((IN_F, HID)),                           # W1
                wspec((1, HID)),                              # b1
                wspec((HID, HID)),                            # W2
                wspec((1, HID)),                              # b2
                wspec((HID, OUT_PAD)),                        # W3
                wspec((1, OUT_PAD)),                          # b3
            ],
            out_specs=pl.BlockSpec((tm, OUT_PAD), lambda i: (i, 0)),
            compiler_params=pltpu.CompilerParams(
                dimension_semantics=("parallel",),
                vmem_limit_bytes=32 * 1024 * 1024),
            cost_estimate=cost,
        )(xp, *params)

    use_single_buf = hasattr(pl, "Buffered")
    try:
        out = call(use_single_buf)
    except Exception:
        # Fallback if single-buffered weight blocks are unsupported on this jax.
        out = call(False)

    return out[:batch, :N_OUT].astype(jnp.float32)


def init_params(key):
    """Deterministic init matching nn.Linear shapes (stored as [in, out])."""
    ks = jax.random.split(key, 6)

    def linear_init(kw, kb, fan_in, fan_out):
        bound = 1.0 / jnp.sqrt(fan_in)
        w = jax.random.uniform(kw, (fan_in, fan_out), jnp.float32, -bound, bound)
        b = jax.random.uniform(kb, (1, fan_out), jnp.float32, -bound, bound)
        return w, b

    w1, b1 = linear_init(ks[0], ks[1], 784, 200)
    w2, b2 = linear_init(ks[2], ks[3], 200, 200)
    w3, b3 = linear_init(ks[4], ks[5], 200, 10)
    return w1, b1, w2, b2, w3, b3


if __name__ == "__main__":
    key = jax.random.PRNGKey(0)
    k_x, k_p = jax.random.split(key)

    batch = 8
    x = jax.random.normal(k_x, (batch, 784), dtype=jnp.float32)
    params = init_params(k_p)

    out = mlp_forward(x, *params)
    jax.block_until_ready(out)

    # Reference in plain JAX (f32). Kernel uses bf16 weights/activations and a
    # bf16 output store with f32 accumulation -> bf16-appropriate tolerance.
    w1, b1, w2, b2, w3, b3 = params
    ref = jnp.tanh(x @ w1 + b1)
    ref = jnp.tanh(ref @ w2 + b2)
    ref = ref @ w3 + b3

    assert out.shape == (batch, N_OUT)
    assert out.dtype == jnp.float32
    assert bool(jnp.allclose(out, ref, atol=5e-2, rtol=5e-2))

    print("KERNEL_OK")
</pallas_src>

<mosaic_0001>
module attributes {stable_mosaic.version = 11 : i64} {
  func.func @mlp_kernel(%arg0: i32, %arg1: memref<16x784xf32, #tpu.memory_space<vmem>>, %arg2: memref<784x256xbf16, #tpu.memory_space<vmem>>, %arg3: memref<1x256xbf16, #tpu.memory_space<vmem>>, %arg4: memref<256x256xbf16, #tpu.memory_space<vmem>>, %arg5: memref<1x256xbf16, #tpu.memory_space<vmem>>, %arg6: memref<256x128xbf16, #tpu.memory_space<vmem>>, %arg7: memref<1x128xf32, #tpu.memory_space<vmem>>, %arg8: memref<16x128xbf16, #tpu.memory_space<vmem>>) attributes {dimension_semantics = [#tpu.dimension_semantics<parallel>], iteration_bounds = array<i64: 1>, scalar_prefetch = 0 : i64, scratch_operands = 0 : i64, tpu.core_type = #tpu.core_type<tc>, window_params = [{transform_indices = @transform_0, window_bounds = array<i64: 16, 784>}, {pipeline_mode = #tpu.pipeline_mode<synchronous>, transform_indices = @transform_1, window_bounds = array<i64: 784, 256>}, {pipeline_mode = #tpu.pipeline_mode<synchronous>, transform_indices = @transform_2, window_bounds = array<i64: 1, 256>}, {pipeline_mode = #tpu.pipeline_mode<synchronous>, transform_indices = @transform_3, window_bounds = array<i64: 256, 256>}, {pipeline_mode = #tpu.pipeline_mode<synchronous>, transform_indices = @transform_4, window_bounds = array<i64: 1, 256>}, {pipeline_mode = #tpu.pipeline_mode<synchronous>, transform_indices = @transform_5, window_bounds = array<i64: 256, 128>}, {pipeline_mode = #tpu.pipeline_mode<synchronous>, transform_indices = @transform_6, window_bounds = array<i64: 1, 128>}, {transform_indices = @transform_7, window_bounds = array<i64: 16, 128>}]} {
    %c0 = arith.constant 0 : index
    %c0_0 = arith.constant 0 : index
    %0 = vector.load %arg1[%c0, %c0_0] : memref<16x784xf32, #tpu.memory_space<vmem>>, vector<16x784xf32>
    %1 = arith.truncf %0 : vector<16x784xf32> to vector<16x784xbf16>
    %c0_1 = arith.constant 0 : index
    %c0_2 = arith.constant 0 : index
    %2 = vector.load %arg2[%c0_1, %c0_2] : memref<784x256xbf16, #tpu.memory_space<vmem>>, vector<784x256xbf16>
    %cst = arith.constant dense<0.000000e+00> : vector<16x256xf32>
    %3 = tpu.matmul %1, %2, %cst {dimension_numbers = #tpu.dot_dimension_numbers<[1], [0], [0], [1], [0, 0, 1, 1], [], []>} : vector<16x784xbf16>, vector<784x256xbf16>, vector<16x256xf32> -> vector<16x256xf32>
    %4 = arith.truncf %3 : vector<16x256xf32> to vector<16x256xbf16>
    %c0_3 = arith.constant 0 : index
    %c0_4 = arith.constant 0 : index
    %5 = vector.load %arg3[%c0_3, %c0_4] : memref<1x256xbf16, #tpu.memory_space<vmem>>, vector<1x256xbf16>
    %6 = vector.broadcast %5 : vector<1x256xbf16> to vector<16x256xbf16>
    %7 = arith.addf %4, %6 : vector<16x256xbf16>
    %8 = math.tanh %7 : vector<16x256xbf16>
    %c0_5 = arith.constant 0 : index
    %c0_6 = arith.constant 0 : index
    %9 = vector.load %arg4[%c0_5, %c0_6] : memref<256x256xbf16, #tpu.memory_space<vmem>>, vector<256x256xbf16>
    %cst_7 = arith.constant dense<0.000000e+00> : vector<16x256xf32>
    %10 = tpu.matmul %8, %9, %cst_7 {dimension_numbers = #tpu.dot_dimension_numbers<[1], [0], [0], [1], [0, 0, 1, 1], [], []>} : vector<16x256xbf16>, vector<256x256xbf16>, vector<16x256xf32> -> vector<16x256xf32>
    %11 = arith.truncf %10 : vector<16x256xf32> to vector<16x256xbf16>
    %c0_8 = arith.constant 0 : index
    %c0_9 = arith.constant 0 : index
    %12 = vector.load %arg5[%c0_8, %c0_9] : memref<1x256xbf16, #tpu.memory_space<vmem>>, vector<1x256xbf16>
    %13 = vector.broadcast %12 : vector<1x256xbf16> to vector<16x256xbf16>
    %14 = arith.addf %11, %13 : vector<16x256xbf16>
    %15 = math.tanh %14 : vector<16x256xbf16>
    %c0_10 = arith.constant 0 : index
    %c0_11 = arith.constant 0 : index
    %16 = vector.load %arg6[%c0_10, %c0_11] : memref<256x128xbf16, #tpu.memory_space<vmem>>, vector<256x128xbf16>
    %cst_12 = arith.constant dense<0.000000e+00> : vector<16x128xf32>
    %17 = tpu.matmul %15, %16, %cst_12 {dimension_numbers = #tpu.dot_dimension_numbers<[1], [0], [0], [1], [0, 0, 1, 1], [], []>} : vector<16x256xbf16>, vector<256x128xbf16>, vector<16x128xf32> -> vector<16x128xf32>
    %c0_13 = arith.constant 0 : index
    %c0_14 = arith.constant 0 : index
    %18 = vector.load %arg7[%c0_13, %c0_14] : memref<1x128xf32, #tpu.memory_space<vmem>>, vector<1x128xf32>
    %19 = vector.broadcast %18 : vector<1x128xf32> to vector<16x128xf32>
    %20 = arith.addf %17, %19 : vector<16x128xf32>
    %21 = arith.truncf %20 : vector<16x128xf32> to vector<16x128xbf16>
    %c0_15 = arith.constant 0 : index
    %c0_16 = arith.constant 0 : index
    %22 = vector.load %arg8[%c0_15, %c0_16] : memref<16x128xbf16, #tpu.memory_space<vmem>>, vector<16x128xbf16>
    tpu.vector_store %arg8[%c0_15, %c0_16], %21 {strides = array<i32>} : memref<16x128xbf16, #tpu.memory_space<vmem>>, vector<16x128xbf16>,
    return
  }
  func.func @transform_0(%arg0: i32) -> (i32, i32) {
    %c0_i32 = arith.constant 0 : i32
    %c0_i32_0 = arith.constant 0 : i32
    return %arg0, %c0_i32 : i32, i32
  }
  func.func @transform_1(%arg0: i32) -> (i32, i32) {
    %c0_i32 = arith.constant 0 : i32
    %c0_i32_0 = arith.constant 0 : i32
    %c0_i32_1 = arith.constant 0 : i32
    return %c0_i32, %c0_i32_0 : i32, i32
  }
  func.func @transform_2(%arg0: i32) -> (i32, i32) {
    %c0_i32 = arith.constant 0 : i32
    %c0_i32_0 = arith.constant 0 : i32
    %c0_i32_1 = arith.constant 0 : i32
    return %c0_i32, %c0_i32_0 : i32, i32
  }
  func.func @transform_3(%arg0: i32) -> (i32, i32) {
    %c0_i32 = arith.constant 0 : i32
    %c0_i32_0 = arith.constant 0 : i32
    %c0_i32_1 = arith.constant 0 : i32
    return %c0_i32, %c0_i32_0 : i32, i32
  }
  func.func @transform_4(%arg0: i32) -> (i32, i32) {
    %c0_i32 = arith.constant 0 : i32
    %c0_i32_0 = arith.constant 0 : i32
    %c0_i32_1 = arith.constant 0 : i32
    return %c0_i32, %c0_i32_0 : i32, i32
  }
  func.func @transform_5(%arg0: i32) -> (i32, i32) {
    %c0_i32 = arith.constant 0 : i32
    %c0_i32_0 = arith.constant 0 : i32
    %c0_i32_1 = arith.constant 0 : i32
    return %c0_i32, %c0_i32_0 : i32, i32
  }
  func.func @transform_6(%arg0: i32) -> (i32, i32) {
    %c0_i32 = arith.constant 0 : i32
    %c0_i32_0 = arith.constant 0 : i32
    %c0_i32_1 = arith.constant 0 : i32
    return %c0_i32, %c0_i32_0 : i32, i32
  }
  func.func @transform_7(%arg0: i32) -> (i32, i32) {
    %c0_i32 = arith.constant 0 : i32
    %c0_i32_0 = arith.constant 0 : i32
    return %arg0, %c0_i32 : i32, i32
  }
}

module attributes {stable_mosaic.version = 11 : i64} {
  func.func @mlp_kernel(%arg0: i32, %arg1: memref<16x784xf32, #tpu.memory_space<vmem>>, %arg2: memref<784x256xbf16, #tpu.memory_space<vmem>>, %arg3: memref<1x256xbf16, #tpu.memory_space<vmem>>, %arg4: memref<256x256xbf16, #tpu.memory_space<vmem>>, %arg5: memref<1x256xbf16, #tpu.memory_space<vmem>>, %arg6: memref<256x128xbf16, #tpu.memory_space<vmem>>, %arg7: memref<1x128xf32, #tpu.memory_space<vmem>>, %arg8: memref<16x128xbf16, #tpu.memory_space<vmem>>) attributes {dimension_semantics = [#tpu.dimension_semantics<parallel>], iteration_bounds = array<i64: 1>, scalar_prefetch = 0 : i64, scratch_operands = 0 : i64, tpu.core_type = #tpu.core_type<tc>, window_params = [{transform_indices = @transform_0, window_bounds = array<i64: 16, 784>}, {pipeline_mode = #tpu.pipeline_mode<synchronous>, transform_indices = @transform_1, window_bounds = array<i64: 784, 256>}, {pipeline_mode = #tpu.pipeline_mode<synchronous>, transform_indices = @transform_2, window_bounds = array<i64: 1, 256>}, {pipeline_mode = #tpu.pipeline_mode<synchronous>, transform_indices = @transform_3, window_bounds = array<i64: 256, 256>}, {pipeline_mode = #tpu.pipeline_mode<synchronous>, transform_indices = @transform_4, window_bounds = array<i64: 1, 256>}, {pipeline_mode = #tpu.pipeline_mode<synchronous>, transform_indices = @transform_5, window_bounds = array<i64: 256, 128>}, {pipeline_mode = #tpu.pipeline_mode<synchronous>, transform_indices = @transform_6, window_bounds = array<i64: 1, 128>}, {transform_indices = @transform_7, window_bounds = array<i64: 16, 128>}]} {
    %c0 = arith.constant 0 : index
    %c0_0 = arith.constant 0 : index
    %0 = vector.load %arg1[%c0, %c0_0] : memref<16x784xf32, #tpu.memory_space<vmem>>, vector<16x784xf32>
    %1 = arith.truncf %0 : vector<16x784xf32> to vector<16x784xbf16>
    %c0_1 = arith.constant 0 : index
    %c0_2 = arith.constant 0 : index
    %2 = vector.load %arg2[%c0_1, %c0_2] : memref<784x256xbf16, #tpu.memory_space<vmem>>, vector<784x256xbf16>
    %cst = arith.constant dense<0.000000e+00> : vector<16x256xf32>
    %3 = tpu.matmul %1, %2, %cst {dimension_numbers = #tpu.dot_dimension_numbers<[1], [0], [0], [1], [0, 0, 1, 1], [], []>} : vector<16x784xbf16>, vector<784x256xbf16>, vector<16x256xf32> -> vector<16x256xf32>
    %4 = arith.truncf %3 : vector<16x256xf32> to vector<16x256xbf16>
    %c0_3 = arith.constant 0 : index
    %c0_4 = arith.constant 0 : index
    %5 = vector.load %arg3[%c0_3, %c0_4] : memref<1x256xbf16, #tpu.memory_space<vmem>>, vector<1x256xbf16>
    %6 = vector.broadcast %5 : vector<1x256xbf16> to vector<16x256xbf16>
    %7 = arith.addf %4, %6 : vector<16x256xbf16>
    %8 = math.tanh %7 : vector<16x256xbf16>
    %c0_5 = arith.constant 0 : index
    %c0_6 = arith.constant 0 : index
    %9 = vector.load %arg4[%c0_5, %c0_6] : memref<256x256xbf16, #tpu.memory_space<vmem>>, vector<256x256xbf16>
    %cst_7 = arith.constant dense<0.000000e+00> : vector<16x256xf32>
    %10 = tpu.matmul %8, %9, %cst_7 {dimension_numbers = #tpu.dot_dimension_numbers<[1], [0], [0], [1], [0, 0, 1, 1], [], []>} : vector<16x256xbf16>, vector<256x256xbf16>, vector<16x256xf32> -> vector<16x256xf32>
    %11 = arith.truncf %10 : vector<16x256xf32> to vector<16x256xbf16>
    %c0_8 = arith.constant 0 : index
    %c0_9 = arith.constant 0 : index
    %12 = vector.load %arg5[%c0_8, %c0_9] : memref<1x256xbf16, #tpu.memory_space<vmem>>, vector<1x256xbf16>
    %13 = vector.broadcast %12 : vector<1x256xbf16> to vector<16x256xbf16>
    %14 = arith.addf %11, %13 : vector<16x256xbf16>
    %15 = math.tanh %14 : vector<16x256xbf16>
    %c0_10 = arith.constant 0 : index
    %c0_11 = arith.constant 0 : index
    %16 = vector.load %arg6[%c0_10, %c0_11] : memref<256x128xbf16, #tpu.memory_space<vmem>>, vector<256x128xbf16>
    %cst_12 = arith.constant dense<0.000000e+00> : vector<16x128xf32>
    %17 = tpu.matmul %15, %16, %cst_12 {dimension_numbers = #tpu.dot_dimension_numbers<[1], [0], [0], [1], [0, 0, 1, 1], [], []>} : vector<16x256xbf16>, vector<256x128xbf16>, vector<16x128xf32> -> vector<16x128xf32>
    %c0_13 = arith.constant 0 : index
    %c0_14 = arith.constant 0 : index
    %18 = vector.load %arg7[%c0_13, %c0_14] : memref<1x128xf32, #tpu.memory_space<vmem>>, vector<1x128xf32>
    %19 = vector.broadcast %18 : vector<1x128xf32> to vector<16x128xf32>
    %20 = arith.addf %17, %19 : vector<16x128xf32>
    %21 = arith.truncf %20 : vector<16x128xf32> to vector<16x128xbf16>
    %c0_15 = arith.constant 0 : index
    %c0_16 = arith.constant 0 : index
    %22 = vector.load %arg8[%c0_15, %c0_16] : memref<16x128xbf16, #tpu.memory_space<vmem>>, vector<16x128xbf16>
    tpu.vector_store %arg8[%c0_15, %c0_16], %21 {strides = array<i32>} : memref<16x128xbf16, #tpu.memory_space<vmem>>, vector<16x128xbf16>,
    return
  }
  func.func @transform_0(%arg0: i32) -> (i32, i32) {
    %c0_i32 = arith.constant 0 : i32
    %c0_i32_0 = arith.constant 0 : i32
    return %arg0, %c0_i32 : i32, i32
  }
  func.func @transform_1(%arg0: i32) -> (i32, i32) {
    %c0_i32 = arith.constant 0 : i32
    %c0_i32_0 = arith.constant 0 : i32
    %c0_i32_1 = arith.constant 0 : i32
    return %c0_i32, %c0_i32_0 : i32, i32
  }
  func.func @transform_2(%arg0: i32) -> (i32, i32) {
    %c0_i32 = arith.constant 0 : i32
    %c0_i32_0 = arith.constant 0 : i32
    %c0_i32_1 = arith.constant 0 : i32
    return %c0_i32, %c0_i32_0 : i32, i32
  }
  func.func @transform_3(%arg0: i32) -> (i32, i32) {
    %c0_i32 = arith.constant 0 : i32
    %c0_i32_0 = arith.constant 0 : i32
    %c0_i32_1 = arith.constant 0 : i32
    return %c0_i32, %c0_i32_0 : i32, i32
  }
  func.func @transform_4(%arg0: i32) -> (i32, i32) {
    %c0_i32 = arith.constant 0 : i32
    %c0_i32_0 = arith.constant 0 : i32
    %c0_i32_1 = arith.constant 0 : i32
    return %c0_i32, %c0_i32_0 : i32, i32
  }
  func.func @transform_5(%arg0: i32) -> (i32, i32) {
    %c0_i32 = arith.constant 0 : i32
    %c0_i32_0 = arith.constant 0 : i32
    %c0_i32_1 = arith.constant 0 : i32
    return %c0_i32, %c0_i32_0 : i32, i32
  }
  func.func @transform_6(%arg0: i32) -> (i32, i32) {
    %c0_i32 = arith.constant 0 : i32
    %c0_i32_0 = arith.constant 0 : i32
    %c0_i32_1 = arith.constant 0 : i32
    return %c0_i32, %c0_i32_0 : i32, i32
  }
  func.func @transform_7(%arg0: i32) -> (i32, i32) {
    %c0_i32 = arith.constant 0 : i32
    %c0_i32_0 = arith.constant 0 : i32
    return %arg0, %c0_i32 : i32, i32
  }
}

</mosaic_0001>

<bundles_post_ra>
// kernel: tpu_custom_call.1
= control target key start
LH: loop header
LB: loop body
LE: loop exit
PB: predicated region body
PF: predicated region fallthrough
CT: control target
= control target key end

     0   :  { %12 = vsyncpa [#allocation3], 0  ;;  %s2080_s0 = inlined_call_operand.hbm [shape: f32[16,784], index: 0, kind: input, shape index: {}]   ;;  %s2081_s1 = inlined_call_operand.hbm [shape: bf16[784,256], index: 1, kind: input, shape index: {}]   ;;  %s2082_s2 = inlined_call_operand.vmem [shape: bf16[1,256], index: 2, kind: input, shape index: {}]   ;;  %s2083_s3 = inlined_call_operand.hbm [shape: bf16[256,256], index: 3, kind: input, shape index: {}]   ;;  %s2084_s4 = inlined_call_operand.vmem [shape: bf16[1,256], index: 4, kind: input, shape index: {}]   ;;  %s2085_s5 = inlined_call_operand.hbm [shape: bf16[256,128], index: 5, kind: input, shape index: {}]   ;;  %s2086_s6 = inlined_call_operand.vmem [shape: f32[1,128], index: 6, kind: input, shape index: {}]   ;;  %s2087_s7 = inlined_call_operand.hbm [shape: bf16[16,128], index: 7, kind: output, shape index: {}]  }
   0x1   :  { %13 = vsyncpa [#allocation6], 0 }
   0x2   :  { %14 = vsyncpa [#allocation9], 0 }
   0x3   :  { %15 = vsyncpa [#allocation4], 0  ;;  %s1939_s24 = smov [#allocation5]   ;;  %s1821_s28 = scalar_lea.hbm %s2081_s1, 12544 }
   0x4   :  { %s33_s25 = sshll.u32 %s1939_s24, 4  ;;  %p1822_p0 = scmp.ne.s32.totalorder %s2081_s1, %s1821_s28  ;;  %s34_s25 = int_to_ptr.vmem [resolvable:$true] %s33_s25 }
   0x5   :  { %p1825_p1 = scmp.lt.u32.totalorder %s1821_s28, %s2081_s1 }
   0x7   :  { %p1827_p2 = pnand %p1825_p1, %p1822_p0 }
   0x9   :  { %1830 = shalt.err (!%p1827_p2)
}
   0xa   :  { %s1831_s10 = scalar_lea.vmem %s34_s25, 12544  ;;  %p1836_p4 = scmp.lt.s32.totalorder %s34_s25, %s34_s25 }
   0xb   :  { %p1832_p3 = scmp.ne.s32.totalorder %s34_s25, %s1831_s10  ;;  %p1837_p5 = scmp.lt.s32.totalorder %s1831_s10, %s1831_s10 }
   0xd   :  { %p1838_p6 = por %p1837_p5, %p1836_p4 }
   0xf   :  { %p1839_p7 = pnand %p1838_p6, %p1832_p3 }
  0x11   :  { %1842 = shalt.err (!%p1839_p7)
}
  0x12   :  { %s1940_s11 = smov 128   ;;  %s1941_s12 = smov 8  }
  0x13   :  { %39 = dma.hbm_to_vmem [thread:$0]  %s2081_s1, 12544, %s34_s25, [#allocation6], %s1940_s11, %s1940_s11, %s1941_s12  }
  0x14   :  { %s1942_s15 = smov [#allocation2]   ;;  %s1843_s19 = scalar_lea.hbm %s2080_s0, 1792 }
  0x15   :  { %s21_s16 = sshll.u32 %s1942_s15, 4  ;;  %p1844_p8 = scmp.ne.s32.totalorder %s2080_s0, %s1843_s19  ;;  %s22_s16 = int_to_ptr.vmem [resolvable:$true] %s21_s16 }
  0x16   :  { %p1847_p9 = scmp.lt.u32.totalorder %s1843_s19, %s2080_s0 }
  0x18   :  { %p1849_p10 = pnand %p1847_p9, %p1844_p8 }
  0x1a   :  { %1852 = shalt.err (!%p1849_p10)
}
  0x1b   :  { %s1853_s24 = scalar_lea.vmem %s22_s16, 1792  ;;  %p1858_p12 = scmp.lt.s32.totalorder %s22_s16, %s22_s16 }
  0x1c   :  { %p1854_p11 = scmp.ne.s32.totalorder %s22_s16, %s1853_s24  ;;  %p1859_p13 = scmp.lt.s32.totalorder %s1853_s24, %s1853_s24 }
  0x1e   :  { %p1860_p0 = por %p1859_p13, %p1858_p12 }
  0x20   :  { %p1861_p1 = pnand %p1860_p0, %p1854_p11 }
  0x22   :  { %1864 = shalt.err (!%p1861_p1)
}
  0x23   :  { %s1943_s1 = smov 896   ;;  %s1944_s25 = smov 56  }
  0x24   :  { %27 = dma.hbm_to_vmem [thread:$0]  %s2080_s0, 1792, %s22_s16, [#allocation3], %s1943_s1, %s1943_s1, %s1944_s25  }
  0x25   :  { %s1945_s28 = smov [#allocation7]   ;;  %s1946_s30 = smov [#allocation8]  }
  0x26   :  { %s47_s29 = sshll.u32 %s1945_s28, 4  ;;  %s61_s8 = sshll.u32 %s1946_s30, 4  ;;  %s48_s29 = int_to_ptr.vmem [resolvable:$true] %s47_s29  ;;  %s2019_s8 = int_to_ptr.vmem [resolvable:$true] %s61_s8 }
  0x27   :  { %s1865_s13 = scalar_lea.hbm %s2083_s3, 4096 }
  0x28   :  { %p1866_p2 = scmp.ne.s32.totalorder %s2083_s3, %s1865_s13  ;;  %p1869_p3 = scmp.lt.u32.totalorder %s1865_s13, %s2083_s3 }
  0x2a   :  { %p1871_p4 = pnand %p1869_p3, %p1866_p2 }
  0x2c   :  { %1874 = shalt.err (!%p1871_p4)
}
  0x2d   :  { %s1875_s0 = scalar_lea.vmem %s48_s29, 4096  ;;  %p1880_p6 = scmp.lt.s32.totalorder %s48_s29, %s48_s29 }
  0x2e   :  { %p1876_p5 = scmp.ne.s32.totalorder %s48_s29, %s1875_s0  ;;  %p1881_p7 = scmp.lt.s32.totalorder %s1875_s0, %s1875_s0 }
  0x30   :  { %p1882_p8 = por %p1881_p7, %p1880_p6 }
  0x32   :  { %p1883_p9 = pnand %p1882_p8, %p1876_p5 }
  0x34   :  { %1886 = shalt.err (!%p1883_p9)
}
  0x35   :  { %53 = dma.hbm_to_vmem [thread:$0]  %s2083_s3, 4096, %s48_s29, [#allocation6], %s1940_s11, %s1940_s11, %s1941_s12  }
  0x36   :  { %s1887_s22 = scalar_lea.hbm %s2085_s5, 2048 }
  0x37   :  { %p1888_p10 = scmp.ne.s32.totalorder %s2085_s5, %s1887_s22  ;;  %p1891_p11 = scmp.lt.u32.totalorder %s1887_s22, %s2085_s5 }
  0x39   :  { %p1893_p12 = pnand %p1891_p11, %p1888_p10 }
  0x3b   :  { %1896 = shalt.err (!%p1893_p12)
}
  0x3c   :  { %s1897_s26 = scalar_lea.vmem %s2019_s8, 2048  ;;  %p1902_p0 = scmp.lt.s32.totalorder %s2019_s8, %s2019_s8 }
  0x3d   :  { %p1898_p13 = scmp.ne.s32.totalorder %s2019_s8, %s1897_s26  ;;  %p1903_p1 = scmp.lt.s32.totalorder %s1897_s26, %s1897_s26 }
  0x3f   :  { %p1904_p2 = por %p1903_p1, %p1902_p0 }
  0x41   :  { %p1905_p3 = pnand %p1904_p2, %p1898_p13 }
  0x43   :  { %1908 = shalt.err (!%p1905_p3)
}
  0x44   :  { %s1947_s3 = smov 64   ;;  %s1948_s11 = smov 4  }
  0x45   :  { %67 = dma.hbm_to_vmem [thread:$0]  %s2085_s5, 2048, %s2019_s8, [#allocation9], %s1947_s3, %s1947_s3, %s1948_s11  }
  0x46   :  { %1931 = dma.done.wait [#allocation3], 1792  }
  0x47   :  { %1932 = vsyncadd [#allocation3], 4294965504 }
  0x48   :  { %1933 = dma.done.wait [#allocation6], 16640  }
  0x49   :  { %1934 = vsyncadd [#allocation6], 4294950656 }
  0x4a   :  { %1935 = dma.done.wait [#allocation9], 2048  }
  0x4b   :  { %1936 = vsyncadd [#allocation9], 4294965248  ;;  %v1602_v0 = vld [vmem:[#allocation5 + $0x104] ss:$8 sps:$4 sm:$0xff]   ;;  %v1604_v1 = vld [vmem:[#allocation5 + $0x100] ss:$8 sps:$4 sm:$0xff]  }
  0x4c   :  { %739 = vmatprep.subr.bf16.mxu0 %v1602_v0  ;;  %v1605_v2 = vld [vmem:[#allocation5 + $0x114] ss:$8 sps:$4 sm:$0xff]   ;;  %v1607_v3 = vld [vmem:[#allocation5 + $0x110] ss:$8 sps:$4 sm:$0xff]   ;;  %v1608_v4 = vld [vmem:[#allocation5 + $0x124] ss:$8 sps:$4 sm:$0xff]  }
  0x4d   :  { %740 = vmatpush1.bf16.msra.mxu0 %v1604_v1  ;;  %v1610_v5 = vld [vmem:[#allocation5 + $0x120] ss:$8 sps:$4 sm:$0xff]   ;;  %v1611_v6 = vld [vmem:[#allocation5 + $0x134] ss:$8 sps:$4 sm:$0xff]   ;;  %v1613_v7 = vld [vmem:[#allocation5 + $0x130] ss:$8 sps:$4 sm:$0xff]  }
  0x4e   :  { %741 = vmatprep.subr.bf16.mxu0 %v1605_v2  ;;  %v1614_v8 = vld [vmem:[#allocation5 + $0x144] ss:$8 sps:$4 sm:$0xff]   ;;  %v1616_v9 = vld [vmem:[#allocation5 + $0x140] ss:$8 sps:$4 sm:$0xff]   ;;  %v1617_v10 = vld [vmem:[#allocation5 + $0x154] ss:$8 sps:$4 sm:$0xff]  }
  0x4f   :  { %v1619_v11 = vld [vmem:[#allocation5 + $0x150] ss:$8 sps:$4 sm:$0xff]   ;;  %v1620_v12 = vld [vmem:[#allocation5 + $0x164] ss:$8 sps:$4 sm:$0xff]   ;;  %v1622_v16 = vld [vmem:[#allocation5 + $0x160] ss:$8 sps:$4 sm:$0xff]  }
  0x50   :  { %v86_v13 = vld [vmem:[#allocation2 + $0x18] sm:$0xff]  ;;  %v93_v14 = vld [vmem:[#allocation2 + $0x50] sm:$0xff]  ;;  %v1623_v17 = vld [vmem:[#allocation5 + $0x174] ss:$8 sps:$4 sm:$0xff]   ;;  %vm692_vm0 = vcmask 130048   ;;  %s1951_s8 = smov [#allocation10]  }
  0x51   :  { %742 = vmatpush1.bf16.msra.mxu0 %v1607_v3  ;;  %v100_v15 = vpack.c.bf16 %v93_v14, %v86_v13  ;;  %v1625_v18 = vld [vmem:[#allocation5 + $0x170] ss:$8 sps:$4 sm:$0xff]   ;;  %v1659_v19 = vld [vmem:[#allocation5 + $0x4] ss:$8 sps:$4 sm:$0xff]   ;;  %v1661_v20 = vld [vmem:[#allocation5] ss:$8 sps:$4 sm:$0xff]  }
  0x52   :  { %743 = vmatprep.subr.bf16.mxu0 %v1608_v4  ;;  %v1626_v21 = vld [vmem:[#allocation5 + $0x184] ss:$8 sps:$4 sm:$0xff]   ;;  %696 = vmatprep.subr.bf16.mxu1 %v1659_v19  ;;  %v1665_v22 = vld [vmem:[#allocation5 + $0x14] ss:$8 sps:$4 sm:$0xff]   ;;  %v1667_v23 = vld [vmem:[#allocation5 + $0x10] ss:$8 sps:$4 sm:$0xff]  }
  0x53   :  { %771 = vmatprep.mubr.bf16.mxu0 %v100_v15  ;;  %697 = vmatpush1.bf16.msra.mxu1 %v1661_v20  ;;  %v1628_v24 = vld [vmem:[#allocation5 + $0x180] ss:$8 sps:$4 sm:$0xff]   ;;  %v1629_v25 = vld [vmem:[#allocation5 + $0x194] ss:$8 sps:$4 sm:$0xff]   ;;  %v1671_v26 = vld [vmem:[#allocation5 + $0x24] ss:$8 sps:$4 sm:$0xff]  }
  0x54   :  { %698 = vmatprep.subr.bf16.mxu1 %v1665_v22  ;;  %v1673_v27 = vld [vmem:[#allocation5 + $0x20] ss:$8 sps:$4 sm:$0xff]   ;;  %v1631_v28 = vld [vmem:[#allocation5 + $0x190] ss:$8 sps:$4 sm:$0xff]   ;;  %v1677_v29 = vld [vmem:[#allocation5 + $0x34] ss:$8 sps:$4 sm:$0xff]  }
  0x55   :  { %744 = vmatpush1.bf16.msra.mxu0 %v1610_v5  ;;  %v1632_v30 = vld [vmem:[#allocation5 + $0x1a4] ss:$8 sps:$4 sm:$0xff]   ;;  %v1679_v31 = vld [vmem:[#allocation5 + $0x30] ss:$8 sps:$4 sm:$0xff]   ;;  %v1634_v32 = vld [vmem:[#allocation5 + $0x1a0] ss:$8 sps:$4 sm:$0xff]  }
  0x56   :  { %745 = vmatprep.subr.bf16.mxu0 %v1611_v6  ;;  %v1683_v33 = vld [vmem:[#allocation5 + $0x44] ss:$8 sps:$4 sm:$0xff]   ;;  %v1635_v34 = vld [vmem:[#allocation5 + $0x1b4] ss:$8 sps:$4 sm:$0xff]   ;;  %v1685_v35 = vld [vmem:[#allocation5 + $0x40] ss:$8 sps:$4 sm:$0xff]  }
  0x57   :  { %699 = vmatpush1.bf16.msra.mxu1 %v1667_v23  ;;  %v1637_v36 = vld [vmem:[#allocation5 + $0x1b0] ss:$8 sps:$4 sm:$0xff]   ;;  %v1689_v37 = vld [vmem:[#allocation5 + $0x54] ss:$8 sps:$4 sm:$0xff]   ;;  %v1638_v38 = vld [vmem:[#allocation5 + $0x1c4] ss:$8 sps:$4 sm:$0xff]  }
  0x58   :  { %700 = vmatprep.subr.bf16.mxu1 %v1671_v26  ;;  %v1691_v39 = vld [vmem:[#allocation5 + $0x50] ss:$8 sps:$4 sm:$0xff]   ;;  %v1640_v40 = vld [vmem:[#allocation5 + $0x1c0] ss:$8 sps:$4 sm:$0xff]   ;;  %v1695_v41 = vld [vmem:[#allocation5 + $0x64] ss:$8 sps:$4 sm:$0xff]  }
  0x59   :  { %746 = vmatpush1.bf16.msra.mxu0 %v1613_v7  ;;  %v1641_v42 = vld [vmem:[#allocation5 + $0x1d4] ss:$8 sps:$4 sm:$0xff]   ;;  %v1697_v43 = vld [vmem:[#allocation5 + $0x60] ss:$8 sps:$4 sm:$0xff]   ;;  %v1643_v44 = vld [vmem:[#allocation5 + $0x1d0] ss:$8 sps:$4 sm:$0xff]  }
  0x5a   :  { %747 = vmatprep.subr.bf16.mxu0 %v1614_v8  ;;  %v1701_v45 = vld [vmem:[#allocation5 + $0x74] ss:$8 sps:$4 sm:$0xff]   ;;  %v1644_v46 = vld [vmem:[#allocation5 + $0x1e4] ss:$8 sps:$4 sm:$0xff]   ;;  %v1703_v47 = vld [vmem:[#allocation5 + $0x70] ss:$8 sps:$4 sm:$0xff]  }
  0x5b   :  { %701 = vmatpush1.bf16.msra.mxu1 %v1673_v27  ;;  %v1646_v48 = vld [vmem:[#allocation5 + $0x1e0] ss:$8 sps:$4 sm:$0xff]   ;;  %v1707_v49 = vld [vmem:[#allocation5 + $0x84] ss:$8 sps:$4 sm:$0xff]   ;;  %v1647_v50 = vld [vmem:[#allocation5 + $0x1f4] ss:$8 sps:$4 sm:$0xff]  }
  0x5c   :  { %702 = vmatprep.subr.bf16.mxu1 %v1677_v29  ;;  %v1649_v51 = vld [vmem:[#allocation5 + $0x1f0] ss:$8 sps:$4 sm:$0xff]   ;;  %v85_v52 = vld [vmem:[#allocation2 + $0x10] sm:$0xff]  ;;  %v1713_v55 = vld [vmem:[#allocation5 + $0x94] ss:$8 sps:$4 sm:$0xff]   ;;  %s1382_s9 = sshll.u32 %s1951_s8, 4  ;;  %s1383_s9 = int_to_ptr.vmem [resolvable:$true] %s1382_s9 }
  0x5d   :  { %748 = vmatpush1.bf16.msra.mxu0 %v1616_v9  ;;  %v1709_v53 = vld [vmem:[#allocation5 + $0x80] ss:$8 sps:$4 sm:$0xff]   ;;  %v92_v54 = vld [vmem:[#allocation2 + $0x48] sm:$0xff]  ;;  %v1652_v56 = vld [vmem:[#allocation5 + $0x204] ss:$8 sps:$4 sm:$0xff]   ;;  %s1909_s10 = scalar_lea.vmem %s1383_s9, 128  ;;  %p1914_p5 = scmp.lt.s32.totalorder %s1383_s9, %s1383_s9 }
  0x5e   :  { %749 = vmatprep.subr.bf16.mxu0 %v1617_v10  ;;  %v99_v57 = vpack.c.bf16 %v92_v54, %v85_v52  ;;  %v1715_v58 = vld [vmem:[#allocation5 + $0x90] ss:$8 sps:$4 sm:$0xff]   ;;  %v1650_v60 = vld [vmem:[#allocation5 + $0x200] ss:$8 sps:$4 sm:$0xff]   ;;  %v1719_v61 = vld [vmem:[#allocation5 + $0xa4] ss:$8 sps:$4 sm:$0xff]   ;;  %p1910_p4 = scmp.ne.s32.totalorder %s1383_s9, %s1909_s10  ;;  %p1915_p6 = scmp.lt.s32.totalorder %s1909_s10, %s1909_s10 }
  0x5f   :  { %703 = vmatpush1.bf16.msra.mxu1 %v1679_v31  ;;  %v88_v59 = vld [vmem:[#allocation2 + $0x28] sm:$0xff]  ;;  %v95_v62 = vld [vmem:[#allocation2 + $0x60] sm:$0xff]  ;;  %v1721_v1 = vld [vmem:[#allocation5 + $0xa0] ss:$8 sps:$4 sm:$0xff]  }
  0x60   :  { %704 = vmatprep.subr.bf16.mxu1 %v1683_v33  ;;  %v1655_v63 = vld [vmem:[#allocation5 + $0x214] ss:$8 sps:$4 sm:$0xff]   ;;  %v102_v0 = vpack.c.bf16 %v95_v62, %v88_v59  ;;  %v1653_v2 = vld [vmem:[#allocation5 + $0x210] ss:$8 sps:$4 sm:$0xff]   ;;  %v1658_v4 = vld [vmem:[#allocation5 + $0x224] ss:$8 sps:$4 sm:$0xff]   ;;  %p1916_p7 = por %p1915_p6, %p1914_p5 }
  0x61   :  { %750 = vmatpush1.bf16.msra.mxu0 %v1619_v11  ;;  %v1725_v3 = vld [vmem:[#allocation5 + $0xb4] ss:$8 sps:$4 sm:$0xff]   ;;  %v1656_v7 = vld [vmem:[#allocation5 + $0x220] ss:$8 sps:$4 sm:$0xff]   ;;  %v1727_v9 = vld [vmem:[#allocation5 + $0xb0] ss:$8 sps:$4 sm:$0xff]  }
  0x62   :  { %751 = vmatprep.subr.bf16.mxu0 %v1620_v12  ;;  %v84_v5 = vld [vmem:[#allocation2 + $0x8] sm:$0xff]  ;;  %v91_v6 = vld [vmem:[#allocation2 + $0x40] sm:$0xff]  ;;  %v1731_v10 = vld [vmem:[#allocation5 + $0xc4] ss:$8 sps:$4 sm:$0xff]   ;;  %p1917_p8 = pnand %p1916_p7, %p1910_p4 }
  0x63   :  { %705 = vmatpush1.bf16.msra.mxu1 %v1685_v35  ;;  %v98_v8 = vpack.c.bf16 %v91_v6, %v84_v5  ;;  %v1664_v11 = vld [vmem:[#allocation5 + $0x234] ss:$8 sps:$4 sm:$0xff]   ;;  %v1662_v12 = vld [vmem:[#allocation5 + $0x230] ss:$8 sps:$4 sm:$0xff]   ;;  %v1733_v13 = vld [vmem:[#allocation5 + $0xc0] ss:$8 sps:$4 sm:$0xff]  }
  0x64   :  { %706 = vmatprep.subr.bf16.mxu1 %v1689_v37  ;;  %v1737_v14 = vld [vmem:[#allocation5 + $0xd4] ss:$8 sps:$4 sm:$0xff]   ;;  %v1670_v15 = vld [vmem:[#allocation5 + $0x244] ss:$8 sps:$4 sm:$0xff]   ;;  %v1674_v20 = vld [vmem:[#allocation5 + $0x250] ss:$8 sps:$4 sm:$0xff]  }
  0x65   :  { %752 = vmatpush1.bf16.msra.mxu0 %v1622_v16  ;;  %728 = vmatprep.mubr.bf16.mxu1 %v98_v8  ;;  %v1668_v16 = vld [vmem:[#allocation5 + $0x240] ss:$8 sps:$4 sm:$0xff]   ;;  %v1676_v19 = vld [vmem:[#allocation5 + $0x254] ss:$8 sps:$4 sm:$0xff]   ;;  %v1686_v31 = vld [vmem:[#allocation5 + $0x270] ss:$8 sps:$4 sm:$0xff]  }
  0x66   :  { %753 = vmatprep.subr.bf16.mxu0 %v1623_v17  ;;  %v1739_v17 = vld [vmem:[#allocation5 + $0xd0] ss:$8 sps:$4 sm:$0xff]   ;;  %v1745_v22 = vld [vmem:[#allocation5 + $0xe0] ss:$8 sps:$4 sm:$0xff]   ;;  %v1746_v23 = vld [vmem:[#allocation5 + $0xf4] ss:$8 sps:$4 sm:$0xff]  }
  0x67   :  { %707 = vmatpush1.bf16.msra.mxu1 %v1691_v39  ;;  %v90_v26 = vld [vmem:[#allocation2 + $0x38] sm:$0xff]  ;;  %v1688_v29 = vld [vmem:[#allocation5 + $0x274] ss:$8 sps:$4 sm:$0xff]   ;;  %v1755_v39 = vld [vmem:[#allocation7 + $0x20] ss:$8 sps:$4 sm:$0xff]   ;;  %v1949_v8 = vmov 0  }
  0x68   :  { %708 = vmatprep.subr.bf16.mxu1 %v1695_v41  ;;  %v1680_v27 = vld [vmem:[#allocation5 + $0x260] ss:$8 sps:$4 sm:$0xff]   ;;  %v1754_v33 = vld [vmem:[#allocation7 + $0x14] ss:$8 sps:$4 sm:$0xff]   ;;  %v1757_v37 = vld [vmem:[#allocation7 + $0x24] ss:$8 sps:$4 sm:$0xff]  }
  0x69   :  { %754 = vmatpush1.bf16.msra.mxu0 %v1625_v18  ;;  %v1743_v18 = vld [vmem:[#allocation5 + $0xe4] ss:$8 sps:$4 sm:$0xff]   ;;  %v1752_v35 = vld [vmem:[#allocation7 + $0x10] ss:$8 sps:$4 sm:$0xff]   ;;  %v1724_v54 = vld [vmem:[#allocation5 + $0x2d4] ss:$8 sps:$4 sm:$0xff]  }
  0x6a   :  { %755 = vmatprep.subr.bf16.mxu0 %v1626_v21  ;;  %v1682_v21 = vld [vmem:[#allocation5 + $0x264] ss:$8 sps:$4 sm:$0xff]   ;;  %v1716_v52 = vld [vmem:[#allocation5 + $0x2c0] ss:$8 sps:$4 sm:$0xff]   ;;  %v1736_v62 = vld [vmem:[#allocation5 + $0x2f4] ss:$8 sps:$4 sm:$0xff]  }
  0x6b   :  { %709 = vmatpush1.bf16.msra.mxu1 %v1697_v43  ;;  %v1760_v41 = vld [vmem:[#allocation7 + $0x34] ss:$8 sps:$4 sm:$0xff]   ;;  %v1758_v43 = vld [vmem:[#allocation7 + $0x30] ss:$8 sps:$4 sm:$0xff]  }
  0x6c   :  { %710 = vmatprep.subr.bf16.mxu1 %v1701_v45  ;;  %v1763_v45 = vld [vmem:[#allocation7 + $0x44] ss:$8 sps:$4 sm:$0xff]   ;;  %v1770_v59 = vld [vmem:[#allocation7 + $0x70] ss:$8 sps:$4 sm:$0xff]  }
  0x6d   :  { %756 = vmatpush1.bf16.msra.mxu0 %v1628_v24  ;;  %v1748_v24 = vld [vmem:[#allocation5 + $0xf0] ss:$8 sps:$4 sm:$0xff]   ;;  %v1776_v6 = vld [vmem:[#allocation7 + $0x90] ss:$8 sps:$4 sm:$0xff]  }
  0x6e   :  { %757 = vmatprep.subr.bf16.mxu0 %v1629_v25  ;;  %v83_v25 = vld [vmem:[#allocation2] sm:$0xff] }
  0x6f   :  { %711 = vmatpush1.bf16.msra.mxu1 %v1703_v47  ;;  %v1761_v47 = vld [vmem:[#allocation7 + $0x40] ss:$8 sps:$4 sm:$0xff]  }
  0x70   :  { %712 = vmatprep.subr.bf16.mxu1 %v1707_v49  ;;  %v1766_v49 = vld [vmem:[#allocation7 + $0x54] ss:$8 sps:$4 sm:$0xff]  }
  0x71   :  { %758 = vmatpush1.bf16.msra.mxu0 %v1631_v28  ;;  %v1751_v28 = vld [vmem:[#allocation7 + $0x4] ss:$8 sps:$4 sm:$0xff]  }
  0x72   :  { %759 = vmatprep.subr.bf16.mxu0 %v1632_v30  ;;  %v1749_v30 = vld [vmem:[#allocation7] ss:$8 sps:$4 sm:$0xff]  }
  0x73   :  { %713 = vmatpush1.bf16.msra.mxu1 %v1709_v53  ;;  %v1769_v53 = vld [vmem:[#allocation7 + $0x64] ss:$8 sps:$4 sm:$0xff]  }
  0x74   :  { %714 = vmatprep.subr.bf16.mxu1 %v1713_v55  ;;  %v1767_v55 = vld [vmem:[#allocation7 + $0x60] ss:$8 sps:$4 sm:$0xff]  }
  0x75   :  { %760 = vmatpush1.bf16.msra.mxu0 %v1634_v32  ;;  %v97_v32 = vpack.c.bf16 %v90_v26, %v83_v25 }
  0x76   :  { %761 = vmatprep.subr.bf16.mxu0 %v1635_v34  ;;  %v1694_v34 = vld [vmem:[#allocation5 + $0x284] ss:$8 sps:$4 sm:$0xff]  }
  0x77   :  { %715 = vmatpush1.bf16.msra.mxu1 %v1715_v58  ;;  %v1730_v58 = vld [vmem:[#allocation5 + $0x2e4] ss:$8 sps:$4 sm:$0xff]  }
  0x78   :  { %716 = vmatprep.subr.bf16.mxu1 %v1719_v61  ;;  %v1775_v61 = vld [vmem:[#allocation7 + $0x84] ss:$8 sps:$4 sm:$0xff]  }
  0x79   :  { %762 = vmatpush1.bf16.msra.mxu0 %v1637_v36  ;;  %v1692_v36 = vld [vmem:[#allocation5 + $0x280] ss:$8 sps:$4 sm:$0xff]  }
  0x7a   :  { %763 = vmatprep.subr.bf16.mxu0 %v1638_v38  ;;  %v1700_v38 = vld [vmem:[#allocation5 + $0x294] ss:$8 sps:$4 sm:$0xff]  }
  0x7b   :  { %717 = vmatpush1.bf16.msra.mxu1 %v1721_v1  ;;  %v87_v1 = vld [vmem:[#allocation2 + $0x20] sm:$0xff] }
  0x7c   :  { %718 = vmatprep.subr.bf16.mxu1 %v1725_v3  ;;  %v1778_v3 = vld [vmem:[#allocation7 + $0x94] ss:$8 sps:$4 sm:$0xff]  }
  0x7d   :  { %764 = vmatpush1.bf16.msra.mxu0 %v1640_v40  ;;  %v1698_v40 = vld [vmem:[#allocation5 + $0x290] ss:$8 sps:$4 sm:$0xff]  }
  0x7e   :  { %765 = vmatprep.subr.bf16.mxu0 %v1641_v42  ;;  %v1706_v42 = vld [vmem:[#allocation5 + $0x2a4] ss:$8 sps:$4 sm:$0xff]  }
  0x7f   :  { %719 = vmatpush1.bf16.msra.mxu1 %v1727_v9  ;;  %v89_v9 = vld [vmem:[#allocation2 + $0x30] sm:$0xff] }
  0x80   :  { %720 = vmatprep.subr.bf16.mxu1 %v1731_v10  ;;  %v96_v10 = vld [vmem:[#allocation2 + $0x68] sm:$0xff] }
  0x81   :  { %766 = vmatpush1.bf16.msra.mxu0 %v1643_v44  ;;  %v1704_v44 = vld [vmem:[#allocation5 + $0x2a0] ss:$8 sps:$4 sm:$0xff]  }
  0x82   :  { %767 = vmatprep.subr.bf16.mxu0 %v1644_v46  ;;  %v1712_v46 = vld [vmem:[#allocation5 + $0x2b4] ss:$8 sps:$4 sm:$0xff]  }
  0x83   :  { %721 = vmatpush1.bf16.msra.mxu1 %v1733_v13  ;;  %v1781_v13 = vld [vmem:[#allocation7 + $0xa4] ss:$8 sps:$4 sm:$0xff]  }
  0x84   :  { %722 = vmatprep.subr.bf16.mxu1 %v1737_v14  ;;  %v1784_v14 = vld [vmem:[#allocation7 + $0xb4] ss:$8 sps:$4 sm:$0xff]  }
  0x85   :  { %768 = vmatpush1.bf16.msra.mxu0 %v1646_v48  ;;  %v1710_v48 = vld [vmem:[#allocation5 + $0x2b0] ss:$8 sps:$4 sm:$0xff]  }
  0x86   :  { %769 = vmatprep.subr.bf16.mxu0 %v1647_v50  ;;  %v1718_v50 = vld [vmem:[#allocation5 + $0x2c4] ss:$8 sps:$4 sm:$0xff]  }
  0x87   :  { %723 = vmatpush1.bf16.msra.mxu1 %v1739_v17  ;;  %v1785_v17 = vld [vmem:[#allocation7 + $0xc0] ss:$8 sps:$4 sm:$0xff]  }
  0x88   :  { %724 = vmatprep.subr.bf16.mxu1 %v1743_v18  ;;  %v1790_v18 = vld [vmem:[#allocation7 + $0xd4] ss:$8 sps:$4 sm:$0xff]  }
  0x89   :  { %770 = vmatpush1.bf16.msra.mxu0 %v1649_v51  ;;  %v1764_v51 = vld [vmem:[#allocation7 + $0x50] ss:$8 sps:$4 sm:$0xff]  }
  0x8a   :  { %782 = vmatprep.subr.bf16.mxu0 %v1652_v56  ;;  %v1722_v56 = vld [vmem:[#allocation5 + $0x2d0] ss:$8 sps:$4 sm:$0xff]  }
  0x8b   :  { %725 = vmatpush1.bf16.msra.mxu1 %v1745_v22  ;;  %v1796_v22 = vld [vmem:[#allocation7 + $0xf4] ss:$8 sps:$4 sm:$0xff]  }
  0x8c   :  { %772 = vmatmul.mubr.bf16.vlgmr.msra.gmra.mrb[0].mxu0 %v99_v57  ;;  %726 = vmatprep.subr.bf16.mxu1 %v1746_v23  ;;  %v1772_v57 = vld [vmem:[#allocation7 + $0x74] ss:$8 sps:$4 sm:$0xff]   ;;  %v1794_v23 = vld [vmem:[#allocation7 + $0xf0] ss:$8 sps:$4 sm:$0xff]  }
  0x8d   :  { %783 = vmatpush1.bf16.msra.mxu0 %v1650_v60  ;;  %814 = vmatprep.mubr.bf16.mxu0 %v102_v0  ;;  %v1728_v60 = vld [vmem:[#allocation5 + $0x2e0] ss:$8 sps:$4 sm:$0xff]   ;;  %v1773_v0 = vld [vmem:[#allocation7 + $0x80] ss:$8 sps:$4 sm:$0xff]  }
  0x8e   :  { %784 = vmatprep.subr.bf16.mxu0 %v1655_v63  ;;  %v1734_v63 = vld [vmem:[#allocation5 + $0x2f0] ss:$8 sps:$4 sm:$0xff]  }
  0x8f   :  { %727 = vmatpush1.bf16.msra.mxu1 %v1748_v24  ;;  %v1797_v24 = vld [vmem:[#allocation8 + $0x40] sm:$0xff]  }
  0x90   :  { %1104 = vmatprep.subr.bf16.mxu1 %v1751_v28 }
  0x91   :  { %785 = vmatpush1.bf16.msra.mxu0 %v1653_v2  ;;  %v94_v2 = vld [vmem:[#allocation2 + $0x58] sm:$0xff] }
  0x92   :  { %786 = vmatprep.subr.bf16.mxu0 %v1658_v4  ;;  %729 = vmatmul.mubr.bf16.vlgmr.msra.gmra.mrb[0].mxu1 %v97_v32  ;;  %v1742_v4 = vld [vmem:[#allocation5 + $0x304] ss:$8 sps:$4 sm:$0xff]   ;;  %v101_v5 = vpack.c.bf16 %v94_v2, %v87_v1  ;;  %v1805_v1 = vld [vmem:[#allocation8 + $0x60] sm:$0xff]  }
  0x93   :  { %1105 = vmatpush1.bf16.msra.mxu1 %v1749_v30  ;;  %v1806_v2 = vld [vmem:[#allocation8 + $0x20] sm:$0xff]  }
  0x94   :  { %1106 = vmatprep.subr.bf16.mxu1 %v1754_v33 }
  0x95   :  { %787 = vmatpush1.bf16.msra.mxu0 %v1656_v7  ;;  %v1740_v7 = vld [vmem:[#allocation5 + $0x300] ss:$8 sps:$4 sm:$0xff]  }
  0x96   :  { %788 = vmatprep.subr.bf16.mxu0 %v1664_v11  ;;  %v103_v11 = vpack.c.bf16 %v96_v10, %v89_v9  ;;  %v1528_v9 = vld.sshfl [vmem:[%s2084_s4] sm:$0x11 pattern:$0x75316420] }
  0x97   :  { %1107 = vmatpush1.bf16.msra.mxu1 %v1752_v35  ;;  %v1158_v10 = vcombine.high %v1528_v9, %v1528_v9 }
  0x98   :  { %1108 = vmatprep.subr.bf16.mxu1 %v1757_v37 }
  0x99   :  { %789 = vmatpush1.bf16.msra.mxu0 %v1662_v12  ;;  %v1779_v12 = vld [vmem:[#allocation7 + $0xa0] ss:$8 sps:$4 sm:$0xff]  }
  0x9a   :  { %790 = vmatprep.subr.bf16.mxu0 %v1670_v15  ;;  %v1782_v15 = vld [vmem:[#allocation7 + $0xb0] ss:$8 sps:$4 sm:$0xff]  }
  0x9b   :  { %1109 = vmatpush1.bf16.msra.mxu1 %v1755_v39 }
  0x9c   :  { %1110 = vmatprep.subr.bf16.mxu1 %v1760_v41 }
  0x9d   :  { %791 = vmatpush1.bf16.msra.mxu0 %v1668_v16  ;;  %v1787_v16 = vld [vmem:[#allocation7 + $0xc4] ss:$8 sps:$4 sm:$0xff]  }
  0x9e   :  { %792 = vmatprep.subr.bf16.mxu0 %v1676_v19  ;;  %v1788_v19 = vld [vmem:[#allocation7 + $0xd0] ss:$8 sps:$4 sm:$0xff]  }
  0x9f   :  { %1111 = vmatpush1.bf16.msra.mxu1 %v1758_v43 }
  0xa0   :  { %1112 = vmatprep.subr.bf16.mxu1 %v1763_v45 }
  0xa1   :  { %793 = vmatpush1.bf16.msra.mxu0 %v1674_v20  ;;  %v1793_v20 = vld [vmem:[#allocation7 + $0xe4] ss:$8 sps:$4 sm:$0xff]  }
  0xa2   :  { %794 = vmatprep.subr.bf16.mxu0 %v1682_v21  ;;  %v1791_v21 = vld [vmem:[#allocation7 + $0xe0] ss:$8 sps:$4 sm:$0xff]  }
  0xa3   :  { %1113 = vmatpush1.bf16.msra.mxu1 %v1761_v47 }
  0xa4   :  { %1114 = vmatprep.subr.bf16.mxu1 %v1766_v49 }
  0xa5   :  { %795 = vmatpush1.bf16.msra.mxu0 %v1680_v27 }
  0xa6   :  { %796 = vmatprep.subr.bf16.mxu0 %v1688_v29  ;;  %v1950_v29 = vmov 1966171168  }
  0xa7   :  { %1115 = vmatpush1.bf16.msra.mxu1 %v1764_v51  ;;  %v881_v30 = vunpack.c.l.s4 %v1950_v29 }
  0xa8   :  { %1116 = vmatprep.subr.bf16.mxu1 %v1769_v53 }
  0xa9   :  { %797 = vmatpush1.bf16.msra.mxu0 %v1686_v31  ;;  %v883_v31 = vlaneseq  ;;  %v882_v32 = vunpack.c.0.s8 %v881_v30 }
  0xaa   :  { %798 = vmatprep.subr.bf16.mxu0 %v1694_v34  ;;  %v1495_v34 = vld.sshfl [vmem:[%s2082_s2] sm:$0x11 pattern:$0x75316420] }
  0xab   :  { %1117 = vmatpush1.bf16.msra.mxu1 %v1767_v55  ;;  %v884_v33 = vshrl.u32 %v883_v31, 7  ;;  %v1529_v31 = vld [vmem:[%s2086_s6] ss:$0 sm:$0xff] }
  0xac   :  { %1118 = vmatprep.subr.bf16.mxu1 %v1772_v57 }
  0xad   :  { %799 = vmatpush1.bf16.msra.mxu0 %v1692_v36  ;;  %v885_v35 = vsub.s32 %v882_v32, %v884_v33  ;;  %v879_v36 = vcombine.high %v1495_v34, %v1495_v34 }
  0xae   :  { %800 = vmatprep.subr.bf16.mxu0 %v1700_v38 }
  0xaf   :  { %1119 = vmatpush1.bf16.msra.mxu1 %v1770_v59  ;;  %v886_v37 = vrot.slane %v1495_v34, %v885_v35  ;;  %v893_v38 = vrot.slane %v879_v36, %v885_v35 }
  0xb0   :  { %1120 = vmatprep.subr.bf16.mxu1 %v1775_v61  ;;  %v1801_v61 = vld [vmem:[#allocation8 + $0x50] sm:$0xff]  }
  0xb1   :  { %801 = vmatpush1.bf16.msra.mxu0 %v1698_v40  ;;  %v895_v39 = vpack.i.b16 %v886_v37, %v886_v37  ;;  %v899_v40 = vsub.s32 0, %v884_v33 }
  0xb2   :  { %802 = vmatprep.subr.bf16.mxu0 %v1706_v42  ;;  %v902_v42 = vpack.i.b16 %v893_v38, %v893_v38 }
  0xb3   :  { %1121 = vmatpush1.bf16.msra.mxu1 %v1773_v0  ;;  %v1804_v0 = vld [vmem:[#allocation8 + $0x18] sm:$0xff]  }
  0xb4   :  { %1122 = vmatprep.subr.bf16.mxu1 %v1778_v3  ;;  %v907_v51 = vrot.slane %v902_v42, %v899_v40  ;;  %v1807_v3 = vld [vmem:[#allocation8 + $0x68] sm:$0xff]  }
  0xb5   :  { %803 = vmatpush1.bf16.msra.mxu0 %v1704_v44 }
  0xb6   :  { %804 = vmatprep.subr.bf16.mxu0 %v1712_v46 }
  0xb7   :  { %1123 = vmatpush1.bf16.msra.mxu1 %v1776_v6  ;;  %v1810_v6 = vld [vmem:[#allocation8 + $0x30] sm:$0xff]  }
  0xb8   :  { %1124 = vmatprep.subr.bf16.mxu1 %v1781_v13 }
  0xb9   :  { %805 = vmatpush1.bf16.msra.mxu0 %v1710_v48  ;;  %v900_v48 = vrot.slane %v895_v39, %v899_v40 }
  0xba   :  { %806 = vmatprep.subr.bf16.mxu0 %v1718_v50 }
  0xbb   :  { %1125 = vmatpush1.bf16.msra.mxu1 %v1779_v12  ;;  %v1172_v12 = vrot.slane %v1158_v10, %v885_v35 }
  0xbc   :  { %1126 = vmatprep.subr.bf16.mxu1 %v1784_v14 }
  0xbd   :  { %807 = vmatpush1.bf16.msra.mxu0 %v1716_v52  ;;  %v1181_v14 = vpack.i.b16 %v1172_v12, %v1172_v12 }
  0xbe   :  { %808 = vmatprep.subr.bf16.mxu0 %v1724_v54 }
  0xbf   :  { %1127 = vmatpush1.bf16.msra.mxu1 %v1782_v15 }
  0xc0   :  { %1128 = vmatprep.subr.bf16.mxu1 %v1787_v16 }
  0xc1   :  { %809 = vmatpush1.bf16.msra.mxu0 %v1722_v56  ;;  %v1798_v56 = vld [vmem:[#allocation8] sm:$0xff]  }
  0xc2   :  { %810 = vmatprep.subr.bf16.mxu0 %v1730_v58  ;;  %v1799_v58 = vld [vmem:[#allocation8 + $0x48] sm:$0xff]  }
  0xc3   :  { %1129 = vmatpush1.bf16.msra.mxu1 %v1785_v17 }
  0xc4   :  { %1130 = vmatprep.subr.bf16.mxu1 %v1790_v18 }
  0xc5   :  { %811 = vmatpush1.bf16.msra.mxu0 %v1728_v60  ;;  %v1800_v60 = vld [vmem:[#allocation8 + $0x8] sm:$0xff]  }
  0xc6   :  { %812 = vmatprep.subr.bf16.mxu0 %v1736_v62  ;;  %v1802_v62 = vld [vmem:[#allocation8 + $0x10] sm:$0xff]  }
  0xc7   :  { %1131 = vmatpush1.bf16.msra.mxu1 %v1788_v19  ;;  %v1186_v19 = vrot.slane %v1181_v14, %v899_v40 }
  0xc8   :  { %1132 = vmatprep.subr.bf16.mxu1 %v1793_v20 }
  0xc9   :  { %813 = vmatpush1.bf16.msra.mxu0 %v1734_v63  ;;  %v1803_v63 = vld [vmem:[#allocation8 + $0x58] sm:$0xff]  }
  0xca   :  { %825 = vmatprep.subr.bf16.mxu0 %v1742_v4  ;;  %v1808_v4 = vld [vmem:[#allocation8 + $0x28] sm:$0xff]  }
  0xcb   :  { %1133 = vmatpush1.bf16.msra.mxu1 %v1791_v21 }
  0xcc   :  { %815 = vmatmul.mubr.bf16.vlgmr.msra.gmra.mrb[0].mxu0 %v101_v5  ;;  %1134 = vmatprep.subr.bf16.mxu1 %v1796_v22  ;;  %v1809_v5 = vld [vmem:[#allocation8 + $0x70] sm:$0xff]  }
  0xcd   :  { %826 = vmatpush1.bf16.msra.mxu0 %v1740_v7  ;;  %857 = vmatprep.mubr.bf16.mxu0 %v1949_v8  ;;  %v1811_v7 = vld [vmem:[#allocation8 + $0x78] sm:$0xff]  }
  0xce   :  { %v1812_v8 = vld [vmem:[#allocation8 + $0x38] sm:$0xff]  }
  0xcf   :  { %1135 = vmatpush1.bf16.msra.mxu1 %v1794_v23 }
  0xd0   :  { %1555 = vmatprep.subr.bf16.mxu1 %v1797_v24 }
  0xd8   :  { %1494 = vmatmul.mubr.msk.bf16.vlgmr.msra.gmra.mrb[0].mxu0 %vm692_vm0, %v103_v11  ;;  %v1165_v11 = vrot.slane %v1528_v9, %v885_v35 }
  0xda   :  { %v1174_v13 = vpack.i.b16 %v1165_v11, %v1165_v11 }
  0xdc   :  { %v1179_v17 = vrot.slane %v1174_v13, %v899_v40 }
 0x165   :  { %v730_v25 = vpop.f32.mrb[0].mxu1 }
 0x166   :  { %v732_v26 = vpop.f32.mrb[1].mxu1 }
 0x167   :  { %v734_v27 = vpop.f32.mrb[2].mxu1 }
 0x168   :  { %v736_v28 = vpop.f32.mrb[3].mxu1 }
 0x1ab   :  { %v859_v41 = vpop.f32.mrb[0].mxu0 }
 0x1ac   :  { %v1577_v43 = vadd.f32 %v859_v41, %v730_v25  ;;  %v861_v44 = vpop.f32.mrb[1].mxu0 }
 0x1ad   :  { %v1578_v45 = vadd.f32 %v861_v44, %v732_v26  ;;  %v863_v46 = vpop.f32.mrb[2].mxu0 }
 0x1ae   :  { %v1579_v47 = vadd.f32 %v863_v46, %v734_v27  ;;  %v865_v49 = vpop.f32.mrb[3].mxu0 }
 0x1af   :  { %v1580_v50 = vadd.f32 %v865_v49, %v736_v28 }
 0x1b0   :  { %v868_v52 = vpack.c.bf16 %v1579_v47, %v1577_v43 }
 0x1b1   :  { %v869_v53 = vpack.c.bf16 %v1580_v50, %v1578_v45 }
 0x1b2   :  { %v908_v54 = vadd.bf16 %v900_v48, %v868_v52 }
 0x1b3   :  { %v909_v55 = vadd.bf16 %v907_v51, %v869_v53 }
 0x1b5   :  { %1813 = vtanh.bf16 %v909_v55 }
 0x1b6   :  { %1815 = vtanh.bf16 %v908_v54 }
 0x1c0   :  { %v1814_v57 = vpop.eup %1813 }
 0x1c1   :  { %v1816_v59 = vpop.eup %1815  ;;  %1136 = vmatprep.mubr.bf16.mxu1 %v1814_v57 }
 0x1c2   :  { %1137 = vmatmul.mubr.bf16.vlgmr.msra.gmra.mrb[4].mxu1 %v1816_v59 }
 0x1c3   :  { %1556 = vmatpush3.bf16.msra.mxu1 %v1798_v56 }
 0x1c4   :  { %1557 = vmatprep.subr.bf16.mxu1 %v1799_v58 }
 0x1c7   :  { %1558 = vmatpush3.bf16.msra.mxu1 %v1800_v60 }
 0x1c8   :  { %1559 = vmatprep.subr.bf16.mxu1 %v1801_v61 }
 0x1cb   :  { %1560 = vmatpush3.bf16.msra.mxu1 %v1802_v62 }
 0x1cc   :  { %1561 = vmatprep.subr.bf16.mxu1 %v1803_v63 }
 0x1cf   :  { %1562 = vmatpush3.bf16.msra.mxu1 %v1804_v0 }
 0x1d0   :  { %1563 = vmatprep.subr.bf16.mxu1 %v1805_v1 }
 0x1d3   :  { %1564 = vmatpush3.bf16.msra.mxu1 %v1806_v2 }
 0x1d4   :  { %1565 = vmatprep.subr.bf16.mxu1 %v1807_v3 }
 0x1d7   :  { %1566 = vmatpush3.bf16.msra.mxu1 %v1808_v4 }
 0x1d8   :  { %1567 = vmatprep.subr.bf16.mxu1 %v1809_v5 }
 0x1db   :  { %1568 = vmatpush3.bf16.msra.mxu1 %v1810_v6 }
 0x1dc   :  { %1569 = vmatprep.subr.bf16.mxu1 %v1811_v7 }
 0x1df   :  { %1570 = vmatpush3.bf16.msra.mxu1 %v1812_v8 }
 0x295   :  { %v1138_v15 = vpop.f32.mrb[4].mxu1 }
 0x296   :  { %v1140_v16 = vpop.f32.mrb[5].mxu1 }
 0x297   :  { %v1142_v18 = vpop.f32.mrb[6].mxu1 }
 0x298   :  { %v1147_v20 = vpack.c.bf16 %v1142_v18, %v1138_v15  ;;  %v1144_v21 = vpop.f32.mrb[7].mxu1 }
 0x299   :  { %v1148_v22 = vpack.c.bf16 %v1144_v21, %v1140_v16 }
 0x29a   :  { %v1187_v23 = vadd.bf16 %v1179_v17, %v1147_v20 }
 0x29b   :  { %v1188_v24 = vadd.bf16 %v1186_v19, %v1148_v22 }
 0x29d   :  { %1817 = vtanh.bf16 %v1188_v24 }
 0x29e   :  { %1819 = vtanh.bf16 %v1187_v23 }
 0x2a8   :  { %v1818_v25 = vpop.eup %1817 }
 0x2a9   :  { %v1820_v26 = vpop.eup %1819  ;;  %1358 = vmatprep.mubr.bf16.mxu1 %v1818_v25 }
 0x2aa   :  { %1359 = vmatmul.mubr.bf16.vlgmr.msra.gmra.mrb[8].mxu1 %v1820_v26 }
 0x37d   :  { %v1571_v27 = vpop.f32.mrb[8].mxu1 }
 0x37e   :  { %v1572_v28 = vpop.f32.mrb[9].mxu1 }
 0x37f   :  { %v1573_v29 = vadd.f32 %v1572_v28, %v1571_v27  ;;  %v1574_v30 = vpop.f32.mrb[10].mxu1 }
 0x380   :  { %v1575_v32 = vpop.f32.mrb[11].mxu1 }
 0x381   :  { %v1576_v33 = vadd.f32 %v1575_v32, %v1574_v30  ;;  %v1361_v34 = vadd.f32 %v1573_v29, %v1529_v31 }
 0x383   :  { %v1364_v35 = vadd.f32 %v1576_v33, %v1529_v31 }
 0x385   :  { %v1553_v36 = vpack.c.bf16 %v1364_v35, %v1361_v34 }
 0x387   :  { %1554 = vst [vmem:[#allocation10] sm:$0xff] %v1553_v36  }
 0x388   :  { %1920 = shalt.err (!%p1917_p8)
}
 0x389   :  { %s1921_s6 = scalar_lea.hbm %s2087_s7, 128 }
 0x38a   :  { %p1922_p9 = scmp.ne.s32.totalorder %s2087_s7, %s1921_s6  ;;  %p1925_p10 = scmp.lt.u32.totalorder %s1921_s6, %s2087_s7 }
 0x38c   :  { %p1927_p11 = pnand %p1925_p10, %p1922_p9 }
 0x38e   :  { %1930 = shalt.err (!%p1927_p11)
}
 0x38f   :  { %1388 = dma.vmem_to_hbm [thread:$0]  %s1383_s9, 128, %s2087_s7, [#allocation4], %s1947_s3, %s1947_s3, %s1948_s11  }
 0x390   :  { %1937 = dma.done.wait [#allocation4], 128  }
 0x391   :  { %1938 = vsyncadd [#allocation4], 4294967168 }
 0x392   :  { %1392 = vsyncpa [#allocation3], 1 }
 0x393   :  { %1393 = vsyncpa [#allocation6], 1 }
 0x394   :  { %1394 = vsyncpa [#allocation9], 1 }
 0x395   :  { %1395 = vsyncpa [#allocation4], 1 }

// kernel: tpu_custom_call.1
= control target key start
LH: loop header
LB: loop body
LE: loop exit
PB: predicated region body
PF: predicated region fallthrough
CT: control target
= control target key end

     0   :  { %12 = vsyncpa [#allocation3], 0  ;;  %s2080_s0 = inlined_call_operand.hbm [shape: f32[16,784], index: 0, kind: input, shape index: {}]   ;;  %s2081_s1 = inlined_call_operand.hbm [shape: bf16[784,256], index: 1, kind: input, shape index: {}]   ;;  %s2082_s2 = inlined_call_operand.vmem [shape: bf16[1,256], index: 2, kind: input, shape index: {}]   ;;  %s2083_s3 = inlined_call_operand.hbm [shape: bf16[256,256], index: 3, kind: input, shape index: {}]   ;;  %s2084_s4 = inlined_call_operand.vmem [shape: bf16[1,256], index: 4, kind: input, shape index: {}]   ;;  %s2085_s5 = inlined_call_operand.hbm [shape: bf16[256,128], index: 5, kind: input, shape index: {}]   ;;  %s2086_s6 = inlined_call_operand.vmem [shape: f32[1,128], index: 6, kind: input, shape index: {}]   ;;  %s2087_s7 = inlined_call_operand.hbm [shape: bf16[16,128], index: 7, kind: output, shape index: {}]  }
   0x1   :  { %13 = vsyncpa [#allocation6], 0 }
   0x2   :  { %14 = vsyncpa [#allocation9], 0 }
   0x3   :  { %15 = vsyncpa [#allocation4], 0  ;;  %s1939_s24 = smov [#allocation5]   ;;  %s1821_s28 = scalar_lea.hbm %s2081_s1, 12544 }
   0x4   :  { %s33_s25 = sshll.u32 %s1939_s24, 4  ;;  %p1822_p0 = scmp.ne.s32.totalorder %s2081_s1, %s1821_s28  ;;  %s34_s25 = int_to_ptr.vmem [resolvable:$true] %s33_s25 }
   0x5   :  { %p1825_p1 = scmp.lt.u32.totalorder %s1821_s28, %s2081_s1 }
   0x7   :  { %p1827_p2 = pnand %p1825_p1, %p1822_p0 }
   0x9   :  { %1830 = shalt.err (!%p1827_p2)
}
   0xa   :  { %s1831_s10 = scalar_lea.vmem %s34_s25, 12544  ;;  %p1836_p4 = scmp.lt.s32.totalorder %s34_s25, %s34_s25 }
   0xb   :  { %p1832_p3 = scmp.ne.s32.totalorder %s34_s25, %s1831_s10  ;;  %p1837_p5 = scmp.lt.s32.totalorder %s1831_s10, %s1831_s10 }
   0xd   :  { %p1838_p6 = por %p1837_p5, %p1836_p4 }
   0xf   :  { %p1839_p7 = pnand %p1838_p6, %p1832_p3 }
  0x11   :  { %1842 = shalt.err (!%p1839_p7)
}
  0x12   :  { %s1940_s11 = smov 128   ;;  %s1941_s12 = smov 8  }
  0x13   :  { %39 = dma.hbm_to_vmem [thread:$0]  %s2081_s1, 12544, %s34_s25, [#allocation6], %s1940_s11, %s1940_s11, %s1941_s12  }
  0x14   :  { %s1942_s15 = smov [#allocation2]   ;;  %s1843_s19 = scalar_lea.hbm %s2080_s0, 1792 }
  0x15   :  { %s21_s16 = sshll.u32 %s1942_s15, 4  ;;  %p1844_p8 = scmp.ne.s32.totalorder %s2080_s0, %s1843_s19  ;;  %s22_s16 = int_to_ptr.vmem [resolvable:$true] %s21_s16 }
  0x16   :  { %p1847_p9 = scmp.lt.u32.totalorder %s1843_s19, %s2080_s0 }
  0x18   :  { %p1849_p10 = pnand %p1847_p9, %p1844_p8 }
  0x1a   :  { %1852 = shalt.err (!%p1849_p10)
}
  0x1b   :  { %s1853_s24 = scalar_lea.vmem %s22_s16, 1792  ;;  %p1858_p12 = scmp.lt.s32.totalorder %s22_s16, %s22_s16 }
  0x1c   :  { %p1854_p11 = scmp.ne.s32.totalorder %s22_s16, %s1853_s24  ;;  %p1859_p13 = scmp.lt.s32.totalorder %s1853_s24, %s1853_s24 }
  0x1e   :  { %p1860_p0 = por %p1859_p13, %p1858_p12 }
  0x20   :  { %p1861_p1 = pnand %p1860_p0, %p1854_p11 }
  0x22   :  { %1864 = shalt.err (!%p1861_p1)
}
  0x23   :  { %s1943_s1 = smov 896   ;;  %s1944_s25 = smov 56  }
  0x24   :  { %27 = dma.hbm_to_vmem [thread:$0]  %s2080_s0, 1792, %s22_s16, [#allocation3], %s1943_s1, %s1943_s1, %s1944_s25  }
  0x25   :  { %s1945_s28 = smov [#allocation7]   ;;  %s1946_s30 = smov [#allocation8]  }
  0x26   :  { %s47_s29 = sshll.u32 %s1945_s28, 4  ;;  %s61_s8 = sshll.u32 %s1946_s30, 4  ;;  %s48_s29 = int_to_ptr.vmem [resolvable:$true] %s47_s29  ;;  %s2019_s8 = int_to_ptr.vmem [resolvable:$true] %s61_s8 }
  0x27   :  { %s1865_s13 = scalar_lea.hbm %s2083_s3, 4096 }
  0x28   :  { %p1866_p2 = scmp.ne.s32.totalorder %s2083_s3, %s1865_s13  ;;  %p1869_p3 = scmp.lt.u32.totalorder %s1865_s13, %s2083_s3 }
  0x2a   :  { %p1871_p4 = pnand %p1869_p3, %p1866_p2 }
  0x2c   :  { %1874 = shalt.err (!%p1871_p4)
}
  0x2d   :  { %s1875_s0 = scalar_lea.vmem %s48_s29, 4096  ;;  %p1880_p6 = scmp.lt.s32.totalorder %s48_s29, %s48_s29 }
  0x2e   :  { %p1876_p5 = scmp.ne.s32.totalorder %s48_s29, %s1875_s0  ;;  %p1881_p7 = scmp.lt.s32.totalorder %s1875_s0, %s1875_s0 }
  0x30   :  { %p1882_p8 = por %p1881_p7, %p1880_p6 }
  0x32   :  { %p1883_p9 = pnand %p1882_p8, %p1876_p5 }
  0x34   :  { %1886 = shalt.err (!%p1883_p9)
}
  0x35   :  { %53 = dma.hbm_to_vmem [thread:$0]  %s2083_s3, 4096, %s48_s29, [#allocation6], %s1940_s11, %s1940_s11, %s1941_s12  }
  0x36   :  { %s1887_s22 = scalar_lea.hbm %s2085_s5, 2048 }
  0x37   :  { %p1888_p10 = scmp.ne.s32.totalorder %s2085_s5, %s1887_s22  ;;  %p1891_p11 = scmp.lt.u32.totalorder %s1887_s22, %s2085_s5 }
  0x39   :  { %p1893_p12 = pnand %p1891_p11, %p1888_p10 }
  0x3b   :  { %1896 = shalt.err (!%p1893_p12)
}
  0x3c   :  { %s1897_s26 = scalar_lea.vmem %s2019_s8, 2048  ;;  %p1902_p0 = scmp.lt.s32.totalorder %s2019_s8, %s2019_s8 }
  0x3d   :  { %p1898_p13 = scmp.ne.s32.totalorder %s2019_s8, %s1897_s26  ;;  %p1903_p1 = scmp.lt.s32.totalorder %s1897_s26, %s1897_s26 }
  0x3f   :  { %p1904_p2 = por %p1903_p1, %p1902_p0 }
  0x41   :  { %p1905_p3 = pnand %p1904_p2, %p1898_p13 }
  0x43   :  { %1908 = shalt.err (!%p1905_p3)
}
  0x44   :  { %s1947_s3 = smov 64   ;;  %s1948_s11 = smov 4  }
  0x45   :  { %67 = dma.hbm_to_vmem [thread:$0]  %s2085_s5, 2048, %s2019_s8, [#allocation9], %s1947_s3, %s1947_s3, %s1948_s11  }
  0x46   :  { %1931 = dma.done.wait [#allocation3], 1792  }
  0x47   :  { %1932 = vsyncadd [#allocation3], 4294965504 }
  0x48   :  { %1933 = dma.done.wait [#allocation6], 16640  }
  0x49   :  { %1934 = vsyncadd [#allocation6], 4294950656 }
  0x4a   :  { %1935 = dma.done.wait [#allocation9], 2048  }
  0x4b   :  { %1936 = vsyncadd [#allocation9], 4294965248  ;;  %v1602_v0 = vld [vmem:[#allocation5 + $0x104] ss:$8 sps:$4 sm:$0xff]   ;;  %v1604_v1 = vld [vmem:[#allocation5 + $0x100] ss:$8 sps:$4 sm:$0xff]  }
  0x4c   :  { %739 = vmatprep.subr.bf16.mxu0 %v1602_v0  ;;  %v1605_v2 = vld [vmem:[#allocation5 + $0x114] ss:$8 sps:$4 sm:$0xff]   ;;  %v1607_v3 = vld [vmem:[#allocation5 + $0x110] ss:$8 sps:$4 sm:$0xff]   ;;  %v1608_v4 = vld [vmem:[#allocation5 + $0x124] ss:$8 sps:$4 sm:$0xff]  }
  0x4d   :  { %740 = vmatpush1.bf16.msra.mxu0 %v1604_v1  ;;  %v1610_v5 = vld [vmem:[#allocation5 + $0x120] ss:$8 sps:$4 sm:$0xff]   ;;  %v1611_v6 = vld [vmem:[#allocation5 + $0x134] ss:$8 sps:$4 sm:$0xff]   ;;  %v1613_v7 = vld [vmem:[#allocation5 + $0x130] ss:$8 sps:$4 sm:$0xff]  }
  0x4e   :  { %741 = vmatprep.subr.bf16.mxu0 %v1605_v2  ;;  %v1614_v8 = vld [vmem:[#allocation5 + $0x144] ss:$8 sps:$4 sm:$0xff]   ;;  %v1616_v9 = vld [vmem:[#allocation5 + $0x140] ss:$8 sps:$4 sm:$0xff]   ;;  %v1617_v10 = vld [vmem:[#allocation5 + $0x154] ss:$8 sps:$4 sm:$0xff]  }
  0x4f   :  { %v1619_v11 = vld [vmem:[#allocation5 + $0x150] ss:$8 sps:$4 sm:$0xff]   ;;  %v1620_v12 = vld [vmem:[#allocation5 + $0x164] ss:$8 sps:$4 sm:$0xff]   ;;  %v1622_v16 = vld [vmem:[#allocation5 + $0x160] ss:$8 sps:$4 sm:$0xff]  }
  0x50   :  { %v86_v13 = vld [vmem:[#allocation2 + $0x18] sm:$0xff]  ;;  %v93_v14 = vld [vmem:[#allocation2 + $0x50] sm:$0xff]  ;;  %v1623_v17 = vld [vmem:[#allocation5 + $0x174] ss:$8 sps:$4 sm:$0xff]   ;;  %vm692_vm0 = vcmask 130048   ;;  %s1951_s8 = smov [#allocation10]  }
  0x51   :  { %742 = vmatpush1.bf16.msra.mxu0 %v1607_v3  ;;  %v100_v15 = vpack.c.bf16 %v93_v14, %v86_v13  ;;  %v1625_v18 = vld [vmem:[#allocation5 + $0x170] ss:$8 sps:$4 sm:$0xff]   ;;  %v1659_v19 = vld [vmem:[#allocation5 + $0x4] ss:$8 sps:$4 sm:$0xff]   ;;  %v1661_v20 = vld [vmem:[#allocation5] ss:$8 sps:$4 sm:$0xff]  }
  0x52   :  { %743 = vmatprep.subr.bf16.mxu0 %v1608_v4  ;;  %v1626_v21 = vld [vmem:[#allocation5 + $0x184] ss:$8 sps:$4 sm:$0xff]   ;;  %696 = vmatprep.subr.bf16.mxu1 %v1659_v19  ;;  %v1665_v22 = vld [vmem:[#allocation5 + $0x14] ss:$8 sps:$4 sm:$0xff]   ;;  %v1667_v23 = vld [vmem:[#allocation5 + $0x10] ss:$8 sps:$4 sm:$0xff]  }
  0x53   :  { %771 = vmatprep.mubr.bf16.mxu0 %v100_v15  ;;  %697 = vmatpush1.bf16.msra.mxu1 %v1661_v20  ;;  %v1628_v24 = vld [vmem:[#allocation5 + $0x180] ss:$8 sps:$4 sm:$0xff]   ;;  %v1629_v25 = vld [vmem:[#allocation5 + $0x194] ss:$8 sps:$4 sm:$0xff]   ;;  %v1671_v26 = vld [vmem:[#allocation5 + $0x24] ss:$8 sps:$4 sm:$0xff]  }
  0x54   :  { %698 = vmatprep.subr.bf16.mxu1 %v1665_v22  ;;  %v1673_v27 = vld [vmem:[#allocation5 + $0x20] ss:$8 sps:$4 sm:$0xff]   ;;  %v1631_v28 = vld [vmem:[#allocation5 + $0x190] ss:$8 sps:$4 sm:$0xff]   ;;  %v1677_v29 = vld [vmem:[#allocation5 + $0x34] ss:$8 sps:$4 sm:$0xff]  }
  0x55   :  { %744 = vmatpush1.bf16.msra.mxu0 %v1610_v5  ;;  %v1632_v30 = vld [vmem:[#allocation5 + $0x1a4] ss:$8 sps:$4 sm:$0xff]   ;;  %v1679_v31 = vld [vmem:[#allocation5 + $0x30] ss:$8 sps:$4 sm:$0xff]   ;;  %v1634_v32 = vld [vmem:[#allocation5 + $0x1a0] ss:$8 sps:$4 sm:$0xff]  }
  0x56   :  { %745 = vmatprep.subr.bf16.mxu0 %v1611_v6  ;;  %v1683_v33 = vld [vmem:[#allocation5 + $0x44] ss:$8 sps:$4 sm:$0xff]   ;;  %v1635_v34 = vld [vmem:[#allocation5 + $0x1b4] ss:$8 sps:$4 sm:$0xff]   ;;  %v1685_v35 = vld [vmem:[#allocation5 + $0x40] ss:$8 sps:$4 sm:$0xff]  }
  0x57   :  { %699 = vmatpush1.bf16.msra.mxu1 %v1667_v23  ;;  %v1637_v36 = vld [vmem:[#allocation5 + $0x1b0] ss:$8 sps:$4 sm:$0xff]   ;;  %v1689_v37 = vld [vmem:[#allocation5 + $0x54] ss:$8 sps:$4 sm:$0xff]   ;;  %v1638_v38 = vld [vmem:[#allocation5 + $0x1c4] ss:$8 sps:$4 sm:$0xff]  }
  0x58   :  { %700 = vmatprep.subr.bf16.mxu1 %v1671_v26  ;;  %v1691_v39 = vld [vmem:[#allocation5 + $0x50] ss:$8 sps:$4 sm:$0xff]   ;;  %v1640_v40 = vld [vmem:[#allocation5 + $0x1c0] ss:$8 sps:$4 sm:$0xff]   ;;  %v1695_v41 = vld [vmem:[#allocation5 + $0x64] ss:$8 sps:$4 sm:$0xff]  }
  0x59   :  { %746 = vmatpush1.bf16.msra.mxu0 %v1613_v7  ;;  %v1641_v42 = vld [vmem:[#allocation5 + $0x1d4] ss:$8 sps:$4 sm:$0xff]   ;;  %v1697_v43 = vld [vmem:[#allocation5 + $0x60] ss:$8 sps:$4 sm:$0xff]   ;;  %v1643_v44 = vld [vmem:[#allocation5 + $0x1d0] ss:$8 sps:$4 sm:$0xff]  }
  0x5a   :  { %747 = vmatprep.subr.bf16.mxu0 %v1614_v8  ;;  %v1701_v45 = vld [vmem:[#allocation5 + $0x74] ss:$8 sps:$4 sm:$0xff]   ;;  %v1644_v46 = vld [vmem:[#allocation5 + $0x1e4] ss:$8 sps:$4 sm:$0xff]   ;;  %v1703_v47 = vld [vmem:[#allocation5 + $0x70] ss:$8 sps:$4 sm:$0xff]  }
  0x5b   :  { %701 = vmatpush1.bf16.msra.mxu1 %v1673_v27  ;;  %v1646_v48 = vld [vmem:[#allocation5 + $0x1e0] ss:$8 sps:$4 sm:$0xff]   ;;  %v1707_v49 = vld [vmem:[#allocation5 + $0x84] ss:$8 sps:$4 sm:$0xff]   ;;  %v1647_v50 = vld [vmem:[#allocation5 + $0x1f4] ss:$8 sps:$4 sm:$0xff]  }
  0x5c   :  { %702 = vmatprep.subr.bf16.mxu1 %v1677_v29  ;;  %v1649_v51 = vld [vmem:[#allocation5 + $0x1f0] ss:$8 sps:$4 sm:$0xff]   ;;  %v85_v52 = vld [vmem:[#allocation2 + $0x10] sm:$0xff]  ;;  %v1713_v55 = vld [vmem:[#allocation5 + $0x94] ss:$8 sps:$4 sm:$0xff]   ;;  %s1382_s9 = sshll.u32 %s1951_s8, 4  ;;  %s1383_s9 = int_to_ptr.vmem [resolvable:$true] %s1382_s9 }
  0x5d   :  { %748 = vmatpush1.bf16.msra.mxu0 %v1616_v9  ;;  %v1709_v53 = vld [vmem:[#allocation5 + $0x80] ss:$8 sps:$4 sm:$0xff]   ;;  %v92_v54 = vld [vmem:[#allocation2 + $0x48] sm:$0xff]  ;;  %v1652_v56 = vld [vmem:[#allocation5 + $0x204] ss:$8 sps:$4 sm:$0xff]   ;;  %s1909_s10 = scalar_lea.vmem %s1383_s9, 128  ;;  %p1914_p5 = scmp.lt.s32.totalorder %s1383_s9, %s1383_s9 }
  0x5e   :  { %749 = vmatprep.subr.bf16.mxu0 %v1617_v10  ;;  %v99_v57 = vpack.c.bf16 %v92_v54, %v85_v52  ;;  %v1715_v58 = vld [vmem:[#allocation5 + $0x90] ss:$8 sps:$4 sm:$0xff]   ;;  %v1650_v60 = vld [vmem:[#allocation5 + $0x200] ss:$8 sps:$4 sm:$0xff]   ;;  %v1719_v61 = vld [vmem:[#allocation5 + $0xa4] ss:$8 sps:$4 sm:$0xff]   ;;  %p1910_p4 = scmp.ne.s32.totalorder %s1383_s9, %s1909_s10  ;;  %p1915_p6 = scmp.lt.s32.totalorder %s1909_s10, %s1909_s10 }
  0x5f   :  { %703 = vmatpush1.bf16.msra.mxu1 %v1679_v31  ;;  %v88_v59 = vld [vmem:[#allocation2 + $0x28] sm:$0xff]  ;;  %v95_v62 = vld [vmem:[#allocation2 + $0x60] sm:$0xff]  ;;  %v1721_v1 = vld [vmem:[#allocation5 + $0xa0] ss:$8 sps:$4 sm:$0xff]  }
  0x60   :  { %704 = vmatprep.subr.bf16.mxu1 %v1683_v33  ;;  %v1655_v63 = vld [vmem:[#allocation5 + $0x214] ss:$8 sps:$4 sm:$0xff]   ;;  %v102_v0 = vpack.c.bf16 %v95_v62, %v88_v59  ;;  %v1653_v2 = vld [vmem:[#allocation5 + $0x210] ss:$8 sps:$4 sm:$0xff]   ;;  %v1658_v4 = vld [vmem:[#allocation5 + $0x224] ss:$8 sps:$4 sm:$0xff]   ;;  %p1916_p7 = por %p1915_p6, %p1914_p5 }
  0x61   :  { %750 = vmatpush1.bf16.msra.mxu0 %v1619_v11  ;;  %v1725_v3 = vld [vmem:[#allocation5 + $0xb4] ss:$8 sps:$4 sm:$0xff]   ;;  %v1656_v7 = vld [vmem:[#allocation5 + $0x220] ss:$8 sps:$4 sm:$0xff]   ;;  %v1727_v9 = vld [vmem:[#allocation5 + $0xb0] ss:$8 sps:$4 sm:$0xff]  }
  0x62   :  { %751 = vmatprep.subr.bf16.mxu0 %v1620_v12  ;;  %v84_v5 = vld [vmem:[#allocation2 + $0x8] sm:$0xff]  ;;  %v91_v6 = vld [vmem:[#allocation2 + $0x40] sm:$0xff]  ;;  %v1731_v10 = vld [vmem:[#allocation5 + $0xc4] ss:$8 sps:$4 sm:$0xff]   ;;  %p1917_p8 = pnand %p1916_p7, %p1910_p4 }
  0x63   :  { %705 = vmatpush1.bf16.msra.mxu1 %v1685_v35  ;;  %v98_v8 = vpack.c.bf16 %v91_v6, %v84_v5  ;;  %v1664_v11 = vld [vmem:[#allocation5 + $0x234] ss:$8 sps:$4 sm:$0xff]   ;;  %v1662_v12 = vld [vmem:[#allocation5 + $0x230] ss:$8 sps:$4 sm:$0xff]   ;;  %v1733_v13 = vld [vmem:[#allocation5 + $0xc0] ss:$8 sps:$4 sm:$0xff]  }
  0x64   :  { %706 = vmatprep.subr.bf16.mxu1 %v1689_v37  ;;  %v1737_v14 = vld [vmem:[#allocation5 + $0xd4] ss:$8 sps:$4 sm:$0xff]   ;;  %v1670_v15 = vld [vmem:[#allocation5 + $0x244] ss:$8 sps:$4 sm:$0xff]   ;;  %v1674_v20 = vld [vmem:[#allocation5 + $0x250] ss:$8 sps:$4 sm:$0xff]  }
  0x65   :  { %752 = vmatpush1.bf16.msra.mxu0 %v1622_v16  ;;  %728 = vmatprep.mubr.bf16.mxu1 %v98_v8  ;;  %v1668_v16 = vld [vmem:[#allocation5 + $0x240] ss:$8 sps:$4 sm:$0xff]   ;;  %v1676_v19 = vld [vmem:[#allocation5 + $0x254] ss:$8 sps:$4 sm:$0xff]   ;;  %v1686_v31 = vld [vmem:[#allocation5 + $0x270] ss:$8 sps:$4 sm:$0xff]  }
  0x66   :  { %753 = vmatprep.subr.bf16.mxu0 %v1623_v17  ;;  %v1739_v17 = vld [vmem:[#allocation5 + $0xd0] ss:$8 sps:$4 sm:$0xff]   ;;  %v1745_v22 = vld [vmem:[#allocation5 + $0xe0] ss:$8 sps:$4 sm:$0xff]   ;;  %v1746_v23 = vld [vmem:[#allocation5 + $0xf4] ss:$8 sps:$4 sm:$0xff]  }
  0x67   :  { %707 = vmatpush1.bf16.msra.mxu1 %v1691_v39  ;;  %v90_v26 = vld [vmem:[#allocation2 + $0x38] sm:$0xff]  ;;  %v1688_v29 = vld [vmem:[#allocation5 + $0x274] ss:$8 sps:$4 sm:$0xff]   ;;  %v1755_v39 = vld [vmem:[#allocation7 + $0x20] ss:$8 sps:$4 sm:$0xff]   ;;  %v1949_v8 = vmov 0  }
  0x68   :  { %708 = vmatprep.subr.bf16.mxu1 %v1695_v41  ;;  %v1680_v27 = vld [vmem:[#allocation5 + $0x260] ss:$8 sps:$4 sm:$0xff]   ;;  %v1754_v33 = vld [vmem:[#allocation7 + $0x14] ss:$8 sps:$4 sm:$0xff]   ;;  %v1757_v37 = vld [vmem:[#allocation7 + $0x24] ss:$8 sps:$4 sm:$0xff]  }
  0x69   :  { %754 = vmatpush1.bf16.msra.mxu0 %v1625_v18  ;;  %v1743_v18 = vld [vmem:[#allocation5 + $0xe4] ss:$8 sps:$4 sm:$0xff]   ;;  %v1752_v35 = vld [vmem:[#allocation7 + $0x10] ss:$8 sps:$4 sm:$0xff]   ;;  %v1724_v54 = vld [vmem:[#allocation5 + $0x2d4] ss:$8 sps:$4 sm:$0xff]  }
  0x6a   :  { %755 = vmatprep.subr.bf16.mxu0 %v1626_v21  ;;  %v1682_v21 = vld [vmem:[#allocation5 + $0x264] ss:$8 sps:$4 sm:$0xff]   ;;  %v1716_v52 = vld [vmem:[#allocation5 + $0x2c0] ss:$8 sps:$4 sm:$0xff]   ;;  %v1736_v62 = vld [vmem:[#allocation5 + $0x2f4] ss:$8 sps:$4 sm:$0xff]  }
  0x6b   :  { %709 = vmatpush1.bf16.msra.mxu1 %v1697_v43  ;;  %v1760_v41 = vld [vmem:[#allocation7 + $0x34] ss:$8 sps:$4 sm:$0xff]   ;;  %v1758_v43 = vld [vmem:[#allocation7 + $0x30] ss:$8 sps:$4 sm:$0xff]  }
  0x6c   :  { %710 = vmatprep.subr.bf16.mxu1 %v1701_v45  ;;  %v1763_v45 = vld [vmem:[#allocation7 + $0x44] ss:$8 sps:$4 sm:$0xff]   ;;  %v1770_v59 = vld [vmem:[#allocation7 + $0x70] ss:$8 sps:$4 sm:$0xff]  }
  0x6d   :  { %756 = vmatpush1.bf16.msra.mxu0 %v1628_v24  ;;  %v1748_v24 = vld [vmem:[#allocation5 + $0xf0] ss:$8 sps:$4 sm:$0xff]   ;;  %v1776_v6 = vld [vmem:[#allocation7 + $0x90] ss:$8 sps:$4 sm:$0xff]  }
  0x6e   :  { %757 = vmatprep.subr.bf16.mxu0 %v1629_v25  ;;  %v83_v25 = vld [vmem:[#allocation2] sm:$0xff] }
  0x6f   :  { %711 = vmatpush1.bf16.msra.mxu1 %v1703_v47  ;;  %v1761_v47 = vld [vmem:[#allocation7 + $0x40] ss:$8 sps:$4 sm:$0xff]  }
  0x70   :  { %712 = vmatprep.subr.bf16.mxu1 %v1707_v49  ;;  %v1766_v49 = vld [vmem:[#allocation7 + $0x54] ss:$8 sps:$4 sm:$0xff]  }
  0x71   :  { %758 = vmatpush1.bf16.msra.mxu0 %v1631_v28  ;;  %v1751_v28 = vld [vmem:[#allocation7 + $0x4] ss:$8 sps:$4 sm:$0xff]  }
  0x72   :  { %759 = vmatprep.subr.bf16.mxu0 %v1632_v30  ;;  %v1749_v30 = vld [vmem:[#allocation7] ss:$8 sps:$4 sm:$0xff]  }
  0x73   :  { %713 = vmatpush1.bf16.msra.mxu1 %v1709_v53  ;;  %v1769_v53 = vld [vmem:[#allocation7 + $0x64] ss:$8 sps:$4 sm:$0xff]  }
  0x74   :  { %714 = vmatprep.subr.bf16.mxu1 %v1713_v55  ;;  %v1767_v55 = vld [vmem:[#allocation7 + $0x60] ss:$8 sps:$4 sm:$0xff]  }
  0x75   :  { %760 = vmatpush1.bf16.msra.mxu0 %v1634_v32  ;;  %v97_v32 = vpack.c.bf16 %v90_v26, %v83_v25 }
  0x76   :  { %761 = vmatprep.subr.bf16.mxu0 %v1635_v34  ;;  %v1694_v34 = vld [vmem:[#allocation5 + $0x284] ss:$8 sps:$4 sm:$0xff]  }
  0x77   :  { %715 = vmatpush1.bf16.msra.mxu1 %v1715_v58  ;;  %v1730_v58 = vld [vmem:[#allocation5 + $0x2e4] ss:$8 sps:$4 sm:$0xff]  }
  0x78   :  { %716 = vmatprep.subr.bf16.mxu1 %v1719_v61  ;;  %v1775_v61 = vld [vmem:[#allocation7 + $0x84] ss:$8 sps:$4 sm:$0xff]  }
  0x79   :  { %762 = vmatpush1.bf16.msra.mxu0 %v1637_v36  ;;  %v1692_v36 = vld [vmem:[#allocation5 + $0x280] ss:$8 sps:$4 sm:$0xff]  }
  0x7a   :  { %763 = vmatprep.subr.bf16.mxu0 %v1638_v38  ;;  %v1700_v38 = vld [vmem:[#allocation5 + $0x294] ss:$8 sps:$4 sm:$0xff]  }
  0x7b   :  { %717 = vmatpush1.bf16.msra.mxu1 %v1721_v1  ;;  %v87_v1 = vld [vmem:[#allocation2 + $0x20] sm:$0xff] }
  0x7c   :  { %718 = vmatprep.subr.bf16.mxu1 %v1725_v3  ;;  %v1778_v3 = vld [vmem:[#allocation7 + $0x94] ss:$8 sps:$4 sm:$0xff]  }
  0x7d   :  { %764 = vmatpush1.bf16.msra.mxu0 %v1640_v40  ;;  %v1698_v40 = vld [vmem:[#allocation5 + $0x290] ss:$8 sps:$4 sm:$0xff]  }
  0x7e   :  { %765 = vmatprep.subr.bf16.mxu0 %v1641_v42  ;;  %v1706_v42 = vld [vmem:[#allocation5 + $0x2a4] ss:$8 sps:$4 sm:$0xff]  }
  0x7f   :  { %719 = vmatpush1.bf16.msra.mxu1 %v1727_v9  ;;  %v89_v9 = vld [vmem:[#allocation2 + $0x30] sm:$0xff] }
  0x80   :  { %720 = vmatprep.subr.bf16.mxu1 %v1731_v10  ;;  %v96_v10 = vld [vmem:[#allocation2 + $0x68] sm:$0xff] }
  0x81   :  { %766 = vmatpush1.bf16.msra.mxu0 %v1643_v44  ;;  %v1704_v44 = vld [vmem:[#allocation5 + $0x2a0] ss:$8 sps:$4 sm:$0xff]  }
  0x82   :  { %767 = vmatprep.subr.bf16.mxu0 %v1644_v46  ;;  %v1712_v46 = vld [vmem:[#allocation5 + $0x2b4] ss:$8 sps:$4 sm:$0xff]  }
  0x83   :  { %721 = vmatpush1.bf16.msra.mxu1 %v1733_v13  ;;  %v1781_v13 = vld [vmem:[#allocation7 + $0xa4] ss:$8 sps:$4 sm:$0xff]  }
  0x84   :  { %722 = vmatprep.subr.bf16.mxu1 %v1737_v14  ;;  %v1784_v14 = vld [vmem:[#allocation7 + $0xb4] ss:$8 sps:$4 sm:$0xff]  }
  0x85   :  { %768 = vmatpush1.bf16.msra.mxu0 %v1646_v48  ;;  %v1710_v48 = vld [vmem:[#allocation5 + $0x2b0] ss:$8 sps:$4 sm:$0xff]  }
  0x86   :  { %769 = vmatprep.subr.bf16.mxu0 %v1647_v50  ;;  %v1718_v50 = vld [vmem:[#allocation5 + $0x2c4] ss:$8 sps:$4 sm:$0xff]  }
  0x87   :  { %723 = vmatpush1.bf16.msra.mxu1 %v1739_v17  ;;  %v1785_v17 = vld [vmem:[#allocation7 + $0xc0] ss:$8 sps:$4 sm:$0xff]  }
  0x88   :  { %724 = vmatprep.subr.bf16.mxu1 %v1743_v18  ;;  %v1790_v18 = vld [vmem:[#allocation7 + $0xd4] ss:$8 sps:$4 sm:$0xff]  }
  0x89   :  { %770 = vmatpush1.bf16.msra.mxu0 %v1649_v51  ;;  %v1764_v51 = vld [vmem:[#allocation7 + $0x50] ss:$8 sps:$4 sm:$0xff]  }
  0x8a   :  { %782 = vmatprep.subr.bf16.mxu0 %v1652_v56  ;;  %v1722_v56 = vld [vmem:[#allocation5 + $0x2d0] ss:$8 sps:$4 sm:$0xff]  }
  0x8b   :  { %725 = vmatpush1.bf16.msra.mxu1 %v1745_v22  ;;  %v1796_v22 = vld [vmem:[#allocation7 + $0xf4] ss:$8 sps:$4 sm:$0xff]  }
  0x8c   :  { %772 = vmatmul.mubr.bf16.vlgmr.msra.gmra.mrb[0].mxu0 %v99_v57  ;;  %726 = vmatprep.subr.bf16.mxu1 %v1746_v23  ;;  %v1772_v57 = vld [vmem:[#allocation7 + $0x74] ss:$8 sps:$4 sm:$0xff]   ;;  %v1794_v23 = vld [vmem:[#allocation7 + $0xf0] ss:$8 sps:$4 sm:$0xff]  }
  0x8d   :  { %783 = vmatpush1.bf16.msra.mxu0 %v1650_v60  ;;  %814 = vmatprep.mubr.bf16.mxu0 %v102_v0  ;;  %v1728_v60 = vld [vmem:[#allocation5 + $0x2e0] ss:$8 sps:$4 sm:$0xff]   ;;  %v1773_v0 = vld [vmem:[#allocation7 + $0x80] ss:$8 sps:$4 sm:$0xff]  }
  0x8e   :  { %784 = vmatprep.subr.bf16.mxu0 %v1655_v63  ;;  %v1734_v63 = vld [vmem:[#allocation5 + $0x2f0] ss:$8 sps:$4 sm:$0xff]  }
  0x8f   :  { %727 = vmatpush1.bf16.msra.mxu1 %v1748_v24  ;;  %v1797_v24 = vld [vmem:[#allocation8 + $0x40] sm:$0xff]  }
  0x90   :  { %1104 = vmatprep.subr.bf16.mxu1 %v1751_v28 }
  0x91   :  { %785 = vmatpush1.bf16.msra.mxu0 %v1653_v2  ;;  %v94_v2 = vld [vmem:[#allocation2 + $0x58] sm:$0xff] }
  0x92   :  { %786 = vmatprep.subr.bf16.mxu0 %v1658_v4  ;;  %729 = vmatmul.mubr.bf16.vlgmr.msra.gmra.mrb[0].mxu1 %v97_v32  ;;  %v1742_v4 = vld [vmem:[#allocation5 + $0x304] ss:$8 sps:$4 sm:$0xff]   ;;  %v101_v5 = vpack.c.bf16 %v94_v2, %v87_v1  ;;  %v1805_v1 = vld [vmem:[#allocation8 + $0x60] sm:$0xff]  }
  0x93   :  { %1105 = vmatpush1.bf16.msra.mxu1 %v1749_v30  ;;  %v1806_v2 = vld [vmem:[#allocation8 + $0x20] sm:$0xff]  }
  0x94   :  { %1106 = vmatprep.subr.bf16.mxu1 %v1754_v33 }
  0x95   :  { %787 = vmatpush1.bf16.msra.mxu0 %v1656_v7  ;;  %v1740_v7 = vld [vmem:[#allocation5 + $0x300] ss:$8 sps:$4 sm:$0xff]  }
  0x96   :  { %788 = vmatprep.subr.bf16.mxu0 %v1664_v11  ;;  %v103_v11 = vpack.c.bf16 %v96_v10, %v89_v9  ;;  %v1528_v9 = vld.sshfl [vmem:[%s2084_s4] sm:$0x11 pattern:$0x75316420] }
  0x97   :  { %1107 = vmatpush1.bf16.msra.mxu1 %v1752_v35  ;;  %v1158_v10 = vcombine.high %v1528_v9, %v1528_v9 }
  0x98   :  { %1108 = vmatprep.subr.bf16.mxu1 %v1757_v37 }
  0x99   :  { %789 = vmatpush1.bf16.msra.mxu0 %v1662_v12  ;;  %v1779_v12 = vld [vmem:[#allocation7 + $0xa0] ss:$8 sps:$4 sm:$0xff]  }
  0x9a   :  { %790 = vmatprep.subr.bf16.mxu0 %v1670_v15  ;;  %v1782_v15 = vld [vmem:[#allocation7 + $0xb0] ss:$8 sps:$4 sm:$0xff]  }
  0x9b   :  { %1109 = vmatpush1.bf16.msra.mxu1 %v1755_v39 }
  0x9c   :  { %1110 = vmatprep.subr.bf16.mxu1 %v1760_v41 }
  0x9d   :  { %791 = vmatpush1.bf16.msra.mxu0 %v1668_v16  ;;  %v1787_v16 = vld [vmem:[#allocation7 + $0xc4] ss:$8 sps:$4 sm:$0xff]  }
  0x9e   :  { %792 = vmatprep.subr.bf16.mxu0 %v1676_v19  ;;  %v1788_v19 = vld [vmem:[#allocation7 + $0xd0] ss:$8 sps:$4 sm:$0xff]  }
  0x9f   :  { %1111 = vmatpush1.bf16.msra.mxu1 %v1758_v43 }
  0xa0   :  { %1112 = vmatprep.subr.bf16.mxu1 %v1763_v45 }
  0xa1   :  { %793 = vmatpush1.bf16.msra.mxu0 %v1674_v20  ;;  %v1793_v20 = vld [vmem:[#allocation7 + $0xe4] ss:$8 sps:$4 sm:$0xff]  }
  0xa2   :  { %794 = vmatprep.subr.bf16.mxu0 %v1682_v21  ;;  %v1791_v21 = vld [vmem:[#allocation7 + $0xe0] ss:$8 sps:$4 sm:$0xff]  }
  0xa3   :  { %1113 = vmatpush1.bf16.msra.mxu1 %v1761_v47 }
  0xa4   :  { %1114 = vmatprep.subr.bf16.mxu1 %v1766_v49 }
  0xa5   :  { %795 = vmatpush1.bf16.msra.mxu0 %v1680_v27 }
  0xa6   :  { %796 = vmatprep.subr.bf16.mxu0 %v1688_v29  ;;  %v1950_v29 = vmov 1966171168  }
  0xa7   :  { %1115 = vmatpush1.bf16.msra.mxu1 %v1764_v51  ;;  %v881_v30 = vunpack.c.l.s4 %v1950_v29 }
  0xa8   :  { %1116 = vmatprep.subr.bf16.mxu1 %v1769_v53 }
  0xa9   :  { %797 = vmatpush1.bf16.msra.mxu0 %v1686_v31  ;;  %v883_v31 = vlaneseq  ;;  %v882_v32 = vunpack.c.0.s8 %v881_v30 }
  0xaa   :  { %798 = vmatprep.subr.bf16.mxu0 %v1694_v34  ;;  %v1495_v34 = vld.sshfl [vmem:[%s2082_s2] sm:$0x11 pattern:$0x75316420] }
  0xab   :  { %1117 = vmatpush1.bf16.msra.mxu1 %v1767_v55  ;;  %v884_v33 = vshrl.u32 %v883_v31, 7  ;;  %v1529_v31 = vld [vmem:[%s2086_s6] ss:$0 sm:$0xff] }
  0xac   :  { %1118 = vmatprep.subr.bf16.mxu1 %v1772_v57 }
  0xad   :  { %799 = vmatpush1.bf16.msra.mxu0 %v1692_v36  ;;  %v885_v35 = vsub.s32 %v882_v32, %v884_v33  ;;  %v879_v36 = vcombine.high %v1495_v34, %v1495_v34 }
  0xae   :  { %800 = vmatprep.subr.bf16.mxu0 %v1700_v38 }
  0xaf   :  { %1119 = vmatpush1.bf16.msra.mxu1 %v1770_v59  ;;  %v886_v37 = vrot.slane %v1495_v34, %v885_v35  ;;  %v893_v38 = vrot.slane %v879_v36, %v885_v35 }
  0xb0   :  { %1120 = vmatprep.subr.bf16.mxu1 %v1775_v61  ;;  %v1801_v61 = vld [vmem:[#allocation8 + $0x50] sm:$0xff]  }
  0xb1   :  { %801 = vmatpush1.bf16.msra.mxu0 %v1698_v40  ;;  %v895_v39 = vpack.i.b16 %v886_v37, %v886_v37  ;;  %v899_v40 = vsub.s32 0, %v884_v33 }
  0xb2   :  { %802 = vmatprep.subr.bf16.mxu0 %v1706_v42  ;;  %v902_v42 = vpack.i.b16 %v893_v38, %v893_v38 }
  0xb3   :  { %1121 = vmatpush1.bf16.msra.mxu1 %v1773_v0  ;;  %v1804_v0 = vld [vmem:[#allocation8 + $0x18] sm:$0xff]  }
  0xb4   :  { %1122 = vmatprep.subr.bf16.mxu1 %v1778_v3  ;;  %v907_v51 = vrot.slane %v902_v42, %v899_v40  ;;  %v1807_v3 = vld [vmem:[#allocation8 + $0x68] sm:$0xff]  }
  0xb5   :  { %803 = vmatpush1.bf16.msra.mxu0 %v1704_v44 }
  0xb6   :  { %804 = vmatprep.subr.bf16.mxu0 %v1712_v46 }
  0xb7   :  { %1123 = vmatpush1.bf16.msra.mxu1 %v1776_v6  ;;  %v1810_v6 = vld [vmem:[#allocation8 + $0x30] sm:$0xff]  }
  0xb8   :  { %1124 = vmatprep.subr.bf16.mxu1 %v1781_v13 }
  0xb9   :  { %805 = vmatpush1.bf16.msra.mxu0 %v1710_v48  ;;  %v900_v48 = vrot.slane %v895_v39, %v899_v40 }
  0xba   :  { %806 = vmatprep.subr.bf16.mxu0 %v1718_v50 }
  0xbb   :  { %1125 = vmatpush1.bf16.msra.mxu1 %v1779_v12  ;;  %v1172_v12 = vrot.slane %v1158_v10, %v885_v35 }
  0xbc   :  { %1126 = vmatprep.subr.bf16.mxu1 %v1784_v14 }
  0xbd   :  { %807 = vmatpush1.bf16.msra.mxu0 %v1716_v52  ;;  %v1181_v14 = vpack.i.b16 %v1172_v12, %v1172_v12 }
  0xbe   :  { %808 = vmatprep.subr.bf16.mxu0 %v1724_v54 }
  0xbf   :  { %1127 = vmatpush1.bf16.msra.mxu1 %v1782_v15 }
  0xc0   :  { %1128 = vmatprep.subr.bf16.mxu1 %v1787_v16 }
  0xc1   :  { %809 = vmatpush1.bf16.msra.mxu0 %v1722_v56  ;;  %v1798_v56 = vld [vmem:[#allocation8] sm:$0xff]  }
  0xc2   :  { %810 = vmatprep.subr.bf16.mxu0 %v1730_v58  ;;  %v1799_v58 = vld [vmem:[#allocation8 + $0x48] sm:$0xff]  }
  0xc3   :  { %1129 = vmatpush1.bf16.msra.mxu1 %v1785_v17 }
  0xc4   :  { %1130 = vmatprep.subr.bf16.mxu1 %v1790_v18 }
  0xc5   :  { %811 = vmatpush1.bf16.msra.mxu0 %v1728_v60  ;;  %v1800_v60 = vld [vmem:[#allocation8 + $0x8] sm:$0xff]  }
  0xc6   :  { %812 = vmatprep.subr.bf16.mxu0 %v1736_v62  ;;  %v1802_v62 = vld [vmem:[#allocation8 + $0x10] sm:$0xff]  }
  0xc7   :  { %1131 = vmatpush1.bf16.msra.mxu1 %v1788_v19  ;;  %v1186_v19 = vrot.slane %v1181_v14, %v899_v40 }
  0xc8   :  { %1132 = vmatprep.subr.bf16.mxu1 %v1793_v20 }
  0xc9   :  { %813 = vmatpush1.bf16.msra.mxu0 %v1734_v63  ;;  %v1803_v63 = vld [vmem:[#allocation8 + $0x58] sm:$0xff]  }
  0xca   :  { %825 = vmatprep.subr.bf16.mxu0 %v1742_v4  ;;  %v1808_v4 = vld [vmem:[#allocation8 + $0x28] sm:$0xff]  }
  0xcb   :  { %1133 = vmatpush1.bf16.msra.mxu1 %v1791_v21 }
  0xcc   :  { %815 = vmatmul.mubr.bf16.vlgmr.msra.gmra.mrb[0].mxu0 %v101_v5  ;;  %1134 = vmatprep.subr.bf16.mxu1 %v1796_v22  ;;  %v1809_v5 = vld [vmem:[#allocation8 + $0x70] sm:$0xff]  }
  0xcd   :  { %826 = vmatpush1.bf16.msra.mxu0 %v1740_v7  ;;  %857 = vmatprep.mubr.bf16.mxu0 %v1949_v8  ;;  %v1811_v7 = vld [vmem:[#allocation8 + $0x78] sm:$0xff]  }
  0xce   :  { %v1812_v8 = vld [vmem:[#allocation8 + $0x38] sm:$0xff]  }
  0xcf   :  { %1135 = vmatpush1.bf16.msra.mxu1 %v1794_v23 }
  0xd0   :  { %1555 = vmatprep.subr.bf16.mxu1 %v1797_v24 }
  0xd8   :  { %1494 = vmatmul.mubr.msk.bf16.vlgmr.msra.gmra.mrb[0].mxu0 %vm692_vm0, %v103_v11  ;;  %v1165_v11 = vrot.slane %v1528_v9, %v885_v35 }
  0xda   :  { %v1174_v13 = vpack.i.b16 %v1165_v11, %v1165_v11 }
  0xdc   :  { %v1179_v17 = vrot.slane %v1174_v13, %v899_v40 }
 0x165   :  { %v730_v25 = vpop.f32.mrb[0].mxu1 }
 0x166   :  { %v732_v26 = vpop.f32.mrb[1].mxu1 }
 0x167   :  { %v734_v27 = vpop.f32.mrb[2].mxu1 }
 0x168   :  { %v736_v28 = vpop.f32.mrb[3].mxu1 }
 0x1ab   :  { %v859_v41 = vpop.f32.mrb[0].mxu0 }
 0x1ac   :  { %v1577_v43 = vadd.f32 %v859_v41, %v730_v25  ;;  %v861_v44 = vpop.f32.mrb[1].mxu0 }
 0x1ad   :  { %v1578_v45 = vadd.f32 %v861_v44, %v732_v26  ;;  %v863_v46 = vpop.f32.mrb[2].mxu0 }
 0x1ae   :  { %v1579_v47 = vadd.f32 %v863_v46, %v734_v27  ;;  %v865_v49 = vpop.f32.mrb[3].mxu0 }
 0x1af   :  { %v1580_v50 = vadd.f32 %v865_v49, %v736_v28 }
 0x1b0   :  { %v868_v52 = vpack.c.bf16 %v1579_v47, %v1577_v43 }
 0x1b1   :  { %v869_v53 = vpack.c.bf16 %v1580_v50, %v1578_v45 }
 0x1b2   :  { %v908_v54 = vadd.bf16 %v900_v48, %v868_v52 }
 0x1b3   :  { %v909_v55 = vadd.bf16 %v907_v51, %v869_v53 }
 0x1b5   :  { %1813 = vtanh.bf16 %v909_v55 }
 0x1b6   :  { %1815 = vtanh.bf16 %v908_v54 }
 0x1c0   :  { %v1814_v57 = vpop.eup %1813 }
 0x1c1   :  { %v1816_v59 = vpop.eup %1815  ;;  %1136 = vmatprep.mubr.bf16.mxu1 %v1814_v57 }
 0x1c2   :  { %1137 = vmatmul.mubr.bf16.vlgmr.msra.gmra.mrb[4].mxu1 %v1816_v59 }
 0x1c3   :  { %1556 = vmatpush3.bf16.msra.mxu1 %v1798_v56 }
 0x1c4   :  { %1557 = vmatprep.subr.bf16.mxu1 %v1799_v58 }
 0x1c7   :  { %1558 = vmatpush3.bf16.msra.mxu1 %v1800_v60 }
 0x1c8   :  { %1559 = vmatprep.subr.bf16.mxu1 %v1801_v61 }
 0x1cb   :  { %1560 = vmatpush3.bf16.msra.mxu1 %v1802_v62 }
 0x1cc   :  { %1561 = vmatprep.subr.bf16.mxu1 %v1803_v63 }
 0x1cf   :  { %1562 = vmatpush3.bf16.msra.mxu1 %v1804_v0 }
 0x1d0   :  { %1563 = vmatprep.subr.bf16.mxu1 %v1805_v1 }
 0x1d3   :  { %1564 = vmatpush3.bf16.msra.mxu1 %v1806_v2 }
 0x1d4   :  { %1565 = vmatprep.subr.bf16.mxu1 %v1807_v3 }
 0x1d7   :  { %1566 = vmatpush3.bf16.msra.mxu1 %v1808_v4 }
 0x1d8   :  { %1567 = vmatprep.subr.bf16.mxu1 %v1809_v5 }
 0x1db   :  { %1568 = vmatpush3.bf16.msra.mxu1 %v1810_v6 }
 0x1dc   :  { %1569 = vmatprep.subr.bf16.mxu1 %v1811_v7 }
 0x1df   :  { %1570 = vmatpush3.bf16.msra.mxu1 %v1812_v8 }
 0x295   :  { %v1138_v15 = vpop.f32.mrb[4].mxu1 }
 0x296   :  { %v1140_v16 = vpop.f32.mrb[5].mxu1 }
 0x297   :  { %v1142_v18 = vpop.f32.mrb[6].mxu1 }
 0x298   :  { %v1147_v20 = vpack.c.bf16 %v1142_v18, %v1138_v15  ;;  %v1144_v21 = vpop.f32.mrb[7].mxu1 }
 0x299   :  { %v1148_v22 = vpack.c.bf16 %v1144_v21, %v1140_v16 }
 0x29a   :  { %v1187_v23 = vadd.bf16 %v1179_v17, %v1147_v20 }
 0x29b   :  { %v1188_v24 = vadd.bf16 %v1186_v19, %v1148_v22 }
 0x29d   :  { %1817 = vtanh.bf16 %v1188_v24 }
 0x29e   :  { %1819 = vtanh.bf16 %v1187_v23 }
 0x2a8   :  { %v1818_v25 = vpop.eup %1817 }
 0x2a9   :  { %v1820_v26 = vpop.eup %1819  ;;  %1358 = vmatprep.mubr.bf16.mxu1 %v1818_v25 }
 0x2aa   :  { %1359 = vmatmul.mubr.bf16.vlgmr.msra.gmra.mrb[8].mxu1 %v1820_v26 }
 0x37d   :  { %v1571_v27 = vpop.f32.mrb[8].mxu1 }
 0x37e   :  { %v1572_v28 = vpop.f32.mrb[9].mxu1 }
 0x37f   :  { %v1573_v29 = vadd.f32 %v1572_v28, %v1571_v27  ;;  %v1574_v30 = vpop.f32.mrb[10].mxu1 }
 0x380   :  { %v1575_v32 = vpop.f32.mrb[11].mxu1 }
 0x381   :  { %v1576_v33 = vadd.f32 %v1575_v32, %v1574_v30  ;;  %v1361_v34 = vadd.f32 %v1573_v29, %v1529_v31 }
 0x383   :  { %v1364_v35 = vadd.f32 %v1576_v33, %v1529_v31 }
 0x385   :  { %v1553_v36 = vpack.c.bf16 %v1364_v35, %v1361_v34 }
 0x387   :  { %1554 = vst [vmem:[#allocation10] sm:$0xff] %v1553_v36  }
 0x388   :  { %1920 = shalt.err (!%p1917_p8)
}
 0x389   :  { %s1921_s6 = scalar_lea.hbm %s2087_s7, 128 }
 0x38a   :  { %p1922_p9 = scmp.ne.s32.totalorder %s2087_s7, %s1921_s6  ;;  %p1925_p10 = scmp.lt.u32.totalorder %s1921_s6, %s2087_s7 }
 0x38c   :  { %p1927_p11 = pnand %p1925_p10, %p1922_p9 }
 0x38e   :  { %1930 = shalt.err (!%p1927_p11)
}
 0x38f   :  { %1388 = dma.vmem_to_hbm [thread:$0]  %s1383_s9, 128, %s2087_s7, [#allocation4], %s1947_s3, %s1947_s3, %s1948_s11  }
 0x390   :  { %1937 = dma.done.wait [#allocation4], 128  }
 0x391   :  { %1938 = vsyncadd [#allocation4], 4294967168 }
 0x392   :  { %1392 = vsyncpa [#allocation3], 1 }
 0x393   :  { %1393 = vsyncpa [#allocation6], 1 }
 0x394   :  { %1394 = vsyncpa [#allocation9], 1 }
 0x395   :  { %1395 = vsyncpa [#allocation4], 1 }

</bundles_post_ra>
